<compile_context>
chip_gen: v6e
topology: v6e:2x2x1
jax: 0.10.0
libtpu: 0.0.40
codegen_flags: <defaults>
</compile_context>

<pallas_src>
import functools
import math

import jax
import jax.numpy as jnp
from jax.experimental import pallas as pl
from jax.experimental.pallas import tpu as pltpu


# ----------------------------------------------------------------------------
# Fused GraphTransformerBlock kernel
# ----------------------------------------------------------------------------
def _graph_block_kernel(
    x_ref, e_ref, bias_ref,
    ln1g, ln1b, wqkv, bqkv, wo, bo,
    wl, wr, we1, be1, we2, be2,
    ln2g, ln2b, w1, b1, w2, b2,
    xo_ref, eo_ref, xl_scr,
    *, n_heads: int, edge_rows: int,
):
    f32 = jnp.float32
    bf16 = jnp.bfloat16

    x = x_ref[0].astype(f32)            # (N, D) residual stream, f32 in-kernel
    N, D = x.shape
    De = e_ref.shape[-1]
    H = n_heads
    dh = D // H

    def layernorm(h, g, b):
        mu = jnp.mean(h, axis=-1, keepdims=True)
        var = jnp.mean((h - mu) ** 2, axis=-1, keepdims=True)
        return (h - mu) * jax.lax.rsqrt(var + 1e-5) * g[...] + b[...]

    # ---- edge-biased multi-head self-attention ----
    # Fused QKV: one full-width (N,D)@(D,3D) matmul; scale pre-folded into q.
    h1 = layernorm(x, ln1g, ln1b).astype(bf16)
    qkv = (jnp.dot(h1, wqkv[...], preferred_element_type=f32) + bqkv[...]).astype(bf16)

    def split_heads(t):                 # (N, H*dh) -> (H, N, dh), static lane slices
        return jnp.stack([t[:, h * dh:(h + 1) * dh] for h in range(H)], axis=0)

    qh = split_heads(qkv[:, :D])
    kh = split_heads(qkv[:, D:2 * D])
    vh = split_heads(qkv[:, 2 * D:])

    logits = jnp.einsum("hne,hme->hnm", qh, kh, preferred_element_type=f32)   # (H,N,N)
    logits = logits + bias_ref[0].astype(f32)   # edge bias + key-padding mask (pre-folded)
    mx = jnp.max(logits, axis=-1, keepdims=True)
    p = jnp.exp(logits - mx)
    a = p * pl.reciprocal(jnp.sum(p, axis=-1, keepdims=True), approx=True)

    ctx = jnp.einsum("hnm,hme->hne", a.astype(bf16), vh,
                     preferred_element_type=f32)                              # (H,N,dh)
    # (H,N,dh) -> (N,H*dh) lane concat, then a single full-width out-projection.
    ctx2 = jnp.concatenate([ctx[h] for h in range(H)], axis=-1).astype(bf16)  # (N,D)
    x = x + jnp.dot(ctx2, wo[...], preferred_element_type=f32) + bo[...]

    # ---- pairwise edge update, row-chunked to bound live VMEM ----
    x_bf = x.astype(bf16)
    xl_scr[...] = jnp.dot(x_bf, wl[...], preferred_element_type=f32)          # (N, De)
    xr = jnp.dot(x_bf, wr[...], preferred_element_type=f32)                   # (N, De)

    chunk_p = edge_rows * N
    n_chunks = N // edge_rows

    @pl.loop(0, n_chunks)
    def _(c):
        p0 = pl.multiple_of(c * chunk_p, chunk_p)
        r0 = pl.multiple_of(c * edge_rows, edge_rows)
        e_c = e_ref[0, pl.ds(p0, chunk_p), :]                                 # (chunk_p, De) bf16
        eproj = jnp.dot(e_c, we1[...], preferred_element_type=f32) + be1[...]
        msg = (eproj.reshape(edge_rows, N, De)
               + xl_scr[pl.ds(r0, edge_rows), :][:, None, :]
               + xr[None, :, :])
        # bf16 GELU (EUP-bound part; ~2x on v6e/v7x, still correct on v5e).
        msg = jax.nn.gelu(msg.astype(bf16), approximate=True).reshape(chunk_p, De)
        e_upd = jnp.dot(msg, we2[...], preferred_element_type=f32) + be2[...]
        eo_ref[0, pl.ds(p0, chunk_p), :] = (e_c.astype(f32) + e_upd).astype(bf16)

    # ---- GEGLU feed-forward ----
    h2 = layernorm(x, ln2g, ln2b).astype(bf16)
    proj = jnp.dot(h2, w1[...], preferred_element_type=f32) + b1[...]         # (N, 8D)
    inner = proj.shape[-1] // 2
    ff = (jax.nn.gelu(proj[:, :inner], approximate=True) * proj[:, inner:]).astype(bf16)
    x = x + jnp.dot(ff, w2[...], preferred_element_type=f32) + b2[...]

    xo_ref[0] = x.astype(bf16)


_BLOCK_WKEYS = (
    "ln1_g", "ln1_b", "wqkv", "bqkv", "wo", "bo",
    "wl", "wr", "we1", "be1", "we2", "be2",
    "ln2_g", "ln2_b", "w1", "b1", "w2", "b2",
)


def _weight_spec(shape):
    zeros = (0,) * len(shape)
    idx = lambda b, _z=zeros: _z
    try:
        # Grid-invariant weights: single-buffer them (no pipelining needed).
        return pl.BlockSpec(shape, idx, pipeline_mode=pl.Buffered(1))
    except TypeError:   # older jax without pipeline_mode kwarg
        return pl.BlockSpec(shape, idx)


def _vmem_limit_bytes():
    # ~48 MiB on 128-MiB parts (v5e/v6e); ~38 MiB on v7x's 64-MiB VMEM.
    try:
        cap = pltpu.get_tpu_info().vmem_capacity_bytes
    except Exception:
        cap = 128 * 1024 * 1024
    return int(min(48 * 1024 * 1024, cap * 0.6))


def _edge_rows(N, De, target_bytes=2 * 1024 * 1024):
    """Largest divisor r of N with r*N*De*4 <= target (chunk of the edge update)."""
    best = 1
    for r in range(1, N + 1):
        if N % r == 0 and r * N * De * 4 <= target_bytes:
            best = r
    return best


def graph_block(x, e, bias, blk, n_heads):
    """One fused GraphTransformerBlock.

    x:(B,N,D) bf16, e:(B,N*N,De) bf16, bias:(B,H,N,N) bf16 (mask folded in).
    """
    B, N, D = x.shape
    P, De = e.shape[1], e.shape[2]
    weights = [blk[k] for k in _BLOCK_WKEYS]
    rows = _edge_rows(N, De)

    in_specs = [
        pl.BlockSpec((1, N, D), lambda b: (b, 0, 0)),
        pl.BlockSpec((1, P, De), lambda b: (b, 0, 0)),
        pl.BlockSpec((1, n_heads, N, N), lambda b: (b, 0, 0, 0)),
    ] + [_weight_spec(w.shape) for w in weights]

    out_specs = (
        pl.BlockSpec((1, N, D), lambda b: (b, 0, 0)),
        pl.BlockSpec((1, P, De), lambda b: (b, 0, 0)),
    )

    x_new, e_new = pl.pallas_call(
        functools.partial(_graph_block_kernel, n_heads=n_heads, edge_rows=rows),
        out_shape=(
            jax.ShapeDtypeStruct((B, N, D), jnp.bfloat16),
            jax.ShapeDtypeStruct((B, P, De), jnp.bfloat16),
        ),
        grid=(B,),
        in_specs=in_specs,
        out_specs=out_specs,
        scratch_shapes=[pltpu.VMEM((N, De), jnp.float32)],
        input_output_aliases={0: 0, 1: 1},   # reuse x/e HBM buffers across layers
        compiler_params=pltpu.CompilerParams(
            dimension_semantics=("parallel",),
            vmem_limit_bytes=_vmem_limit_bytes(),
        ),
    )(x, e, bias, *weights)
    return x_new, e_new


# ----------------------------------------------------------------------------
# Plain-JAX glue: positional encoding, params, forward
# ----------------------------------------------------------------------------
def get_1d_sincos_encode(steps, emb_dim, max_period):
    half = emb_dim // 2
    freqs = jnp.exp(
        -math.log(max_period) * jnp.arange(half, dtype=jnp.float32) / half
    )
    args = steps.astype(jnp.float32)[:, None] * freqs[None, :]
    return jnp.concatenate([jnp.sin(args), jnp.cos(args)], axis=-1)


def make_params(key, node_dim, edge_dim, objfeat_dim, bbox_dim, attn_dim,
                n_heads, n_layers, ff_mult=4):
    D = attn_dim
    De = D // 4
    dh = D // n_heads
    scale = 1.0 / math.sqrt(dh)
    f32, bf16 = jnp.float32, jnp.bfloat16
    keys = iter(jax.random.split(key, 8 + 20 * n_layers))

    def w(shape, dtype=f32):
        return (jax.random.normal(next(keys), shape, f32) * 0.02).astype(dtype)

    p = {
        "node_emb_table": w((node_dim, D)),
        "node_emb_w": w((D, D)),
        "node_emb_b": jnp.zeros((D,), f32),
        "node_proj_w": w((D + objfeat_dim + bbox_dim, D)),
        "node_proj_b": jnp.zeros((D,), f32),
        "edge_emb_table": w((edge_dim, De)),
        "edge_emb_w": w((De, De)),
        "edge_emb_b": jnp.zeros((De,), f32),
    }
    blocks = []
    for _ in range(n_layers):
        wq, wk, wv = w((D, D)), w((D, D)), w((D, D))
        bq = jnp.zeros((D,), f32)
        bk = jnp.zeros((D,), f32)
        bv = jnp.zeros((D,), f32)
        blocks.append({
            "ln1_g": jnp.ones((1, D), f32), "ln1_b": jnp.zeros((1, D), f32),
            # Fused QKV; 1/sqrt(dh) folded into the q columns (one-time fold).
            "wqkv": jnp.concatenate([wq * scale, wk, wv], axis=1).astype(bf16),
            "bqkv": jnp.concatenate([bq * scale, bk, bv])[None].astype(f32),
            # Single full-width output projection (heads concatenated on lanes).
            "wo": w((D, D), bf16), "bo": jnp.zeros((1, D), f32),
            # Per-head edge->bias projection (applied in XLA; tiny output width).
            "webT": w((n_heads, De), bf16), "beb": jnp.zeros((n_heads, 1), f32),
            "wl": w((D, De), bf16), "wr": w((D, De), bf16),
            "we1": w((De, De), bf16), "be1": jnp.zeros((1, De), f32),
            "we2": w((De, De), bf16), "be2": jnp.zeros((1, De), f32),
            "ln2_g": jnp.ones((1, D), f32), "ln2_b": jnp.zeros((1, D), f32),
            "w1": w((D, 2 * ff_mult * D), bf16),
            "b1": jnp.zeros((1, 2 * ff_mult * D), f32),
            "w2": w((ff_mult * D, D), bf16), "b2": jnp.zeros((1, D), f32),
        })
    p["blocks"] = blocks
    return p


def sg2sc_forward(params, box, x, e, o, mask, n_heads):
    B, N = x.shape
    D = params["node_emb_table"].shape[1]
    De = D // 4
    f32, bf16 = jnp.float32, jnp.bfloat16

    # Tiny embedding / projection head stays in XLA (per review: standalone
    # Pallas calls here are pure launch overhead / masked-store penalty).
    xe = jnp.take(params["node_emb_table"], x, axis=0)
    xe = jax.nn.gelu(xe, approximate=False) @ params["node_emb_w"] + params["node_emb_b"]
    xe = (jnp.concatenate([xe, o, box], axis=-1) @ params["node_proj_w"]
          + params["node_proj_b"])

    ee = jnp.take(params["edge_emb_table"], e, axis=0)
    ee = jax.nn.gelu(ee, approximate=False) @ params["edge_emb_w"] + params["edge_emb_b"]
    eye = jnp.eye(N, dtype=bool)
    ee = ee * (~eye).astype(f32)[None, :, :, None]            # zero self-edges

    inst = get_1d_sincos_encode(jnp.arange(N), D, N)[None]     # (1, N, D)
    xe = xe + inst

    # bf16 residual streams in HBM; edge tensor flattened (B, N*N, De), De on lanes.
    xe = xe.astype(bf16)
    ee = ee.reshape(B, N * N, De).astype(bf16)

    # Key-padding additive mask, folded once into the per-layer bias.
    neg_inf = ((1.0 - mask.astype(f32)) * (-1e9)).reshape(B, 1, 1, N)

    for blk in params["blocks"]:
        # Per-head edge attention bias (De -> n_heads) in XLA, head-major,
        # mask folded in, handed to the kernel in bf16 (halves HBM traffic).
        bias = jnp.einsum("bpe,he->bhp", ee, blk["webT"],
                          preferred_element_type=f32) + blk["beb"][None]
        bias = (bias.reshape(B, n_heads, N, N) + neg_inf).astype(bf16)
        xe, ee = graph_block(xe, ee, bias, blk, n_heads)

    return xe.astype(f32)


if __name__ == "__main__":
    B, N = 2, 8
    node_dim, edge_dim = 10, 6
    objfeat_dim, bbox_dim = 16, 8
    attn_dim, n_heads, n_layers = 64, 4, 2

    key = jax.random.PRNGKey(0)
    k1, k2, k3, k4, kp = jax.random.split(key, 5)
    box = jax.random.normal(k1, (B, N, bbox_dim), jnp.float32)
    x = jax.random.randint(k2, (B, N), 0, node_dim, dtype=jnp.int32)
    e = jax.random.randint(k3, (B, N, N), 0, edge_dim, dtype=jnp.int32)
    o = jax.random.normal(k4, (B, N, objfeat_dim), jnp.float32)
    mask = jnp.ones((B, N), jnp.int32)

    params = make_params(kp, node_dim, edge_dim, objfeat_dim, bbox_dim,
                         attn_dim, n_heads, n_layers)

    fwd = jax.jit(sg2sc_forward, static_argnames=("n_heads",))
    out = fwd(params, box, x, e, o, mask, n_heads=n_heads)
    out = jax.block_until_ready(out)
    assert out.shape == (B, N, attn_dim), out.shape
    assert bool(jnp.all(jnp.isfinite(out)))
    print("KERNEL_OK")
</pallas_src>

<mosaic_0001>
module attributes {stable_mosaic.version = 11 : i64} {
  func.func @_graph_block_kernel(%arg0: i32, %arg1: memref<1x8x64xbf16, #tpu.memory_space<vmem>>, %arg2: memref<1x64x16xbf16, #tpu.memory_space<vmem>>, %arg3: memref<1x4x8x8xbf16, #tpu.memory_space<vmem>>, %arg4: memref<1x64xf32, #tpu.memory_space<vmem>>, %arg5: memref<1x64xf32, #tpu.memory_space<vmem>>, %arg6: memref<64x192xbf16, #tpu.memory_space<vmem>>, %arg7: memref<1x192xf32, #tpu.memory_space<vmem>>, %arg8: memref<64x64xbf16, #tpu.memory_space<vmem>>, %arg9: memref<1x64xf32, #tpu.memory_space<vmem>>, %arg10: memref<64x16xbf16, #tpu.memory_space<vmem>>, %arg11: memref<64x16xbf16, #tpu.memory_space<vmem>>, %arg12: memref<16x16xbf16, #tpu.memory_space<vmem>>, %arg13: memref<1x16xf32, #tpu.memory_space<vmem>>, %arg14: memref<16x16xbf16, #tpu.memory_space<vmem>>, %arg15: memref<1x16xf32, #tpu.memory_space<vmem>>, %arg16: memref<1x64xf32, #tpu.memory_space<vmem>>, %arg17: memref<1x64xf32, #tpu.memory_space<vmem>>, %arg18: memref<64x512xbf16, #tpu.memory_space<vmem>>, %arg19: memref<1x512xf32, #tpu.memory_space<vmem>>, %arg20: memref<256x64xbf16, #tpu.memory_space<vmem>>, %arg21: memref<1x64xf32, #tpu.memory_space<vmem>>, %arg22: memref<1x8x64xbf16, #tpu.memory_space<vmem>>, %arg23: memref<1x64x16xbf16, #tpu.memory_space<vmem>>, %arg24: memref<8x16xf32, #tpu.memory_space<vmem>>) attributes {dimension_semantics = [#tpu.dimension_semantics<parallel>], iteration_bounds = array<i64: 2>, scalar_prefetch = 0 : i64, scratch_operands = 1 : i64, tpu.core_type = #tpu.core_type<tc>, window_params = [{transform_indices = @transform_0, window_bounds = array<i64: 1, 8, 64>}, {transform_indices = @transform_1, window_bounds = array<i64: 1, 64, 16>}, {transform_indices = @transform_2, window_bounds = array<i64: 1, 4, 8, 8>}, {pipeline_mode = #tpu.pipeline_mode<synchronous>, transform_indices = @transform_3, window_bounds = array<i64: 1, 64>}, {pipeline_mode = #tpu.pipeline_mode<synchronous>, transform_indices = @transform_4, window_bounds = array<i64: 1, 64>}, {pipeline_mode = #tpu.pipeline_mode<synchronous>, transform_indices = @transform_5, window_bounds = array<i64: 64, 192>}, {pipeline_mode = #tpu.pipeline_mode<synchronous>, transform_indices = @transform_6, window_bounds = array<i64: 1, 192>}, {pipeline_mode = #tpu.pipeline_mode<synchronous>, transform_indices = @transform_7, window_bounds = array<i64: 64, 64>}, {pipeline_mode = #tpu.pipeline_mode<synchronous>, transform_indices = @transform_8, window_bounds = array<i64: 1, 64>}, {pipeline_mode = #tpu.pipeline_mode<synchronous>, transform_indices = @transform_9, window_bounds = array<i64: 64, 16>}, {pipeline_mode = #tpu.pipeline_mode<synchronous>, transform_indices = @transform_10, window_bounds = array<i64: 64, 16>}, {pipeline_mode = #tpu.pipeline_mode<synchronous>, transform_indices = @transform_11, window_bounds = array<i64: 16, 16>}, {pipeline_mode = #tpu.pipeline_mode<synchronous>, transform_indices = @transform_12, window_bounds = array<i64: 1, 16>}, {pipeline_mode = #tpu.pipeline_mode<synchronous>, transform_indices = @transform_13, window_bounds = array<i64: 16, 16>}, {pipeline_mode = #tpu.pipeline_mode<synchronous>, transform_indices = @transform_14, window_bounds = array<i64: 1, 16>}, {pipeline_mode = #tpu.pipeline_mode<synchronous>, transform_indices = @transform_15, window_bounds = array<i64: 1, 64>}, {pipeline_mode = #tpu.pipeline_mode<synchronous>, transform_indices = @transform_16, window_bounds = array<i64: 1, 64>}, {pipeline_mode = #tpu.pipeline_mode<synchronous>, transform_indices = @transform_17, window_bounds = array<i64: 64, 512>}, {pipeline_mode = #tpu.pipeline_mode<synchronous>, transform_indices = @transform_18, window_bounds = array<i64: 1, 512>}, {pipeline_mode = #tpu.pipeline_mode<synchronous>, transform_indices = @transform_19, window_bounds = array<i64: 256, 64>}, {pipeline_mode = #tpu.pipeline_mode<synchronous>, transform_indices = @transform_20, window_bounds = array<i64: 1, 64>}, {transform_indices = @transform_21, window_bounds = array<i64: 1, 8, 64>}, {transform_indices = @transform_22, window_bounds = array<i64: 1, 64, 16>}]} {
    %c0 = arith.constant 0 : index
    %c0_0 = arith.constant 0 : index
    %c0_1 = arith.constant 0 : index
    %0 = vector.load %arg1[%c0, %c0_0, %c0_1] : memref<1x8x64xbf16, #tpu.memory_space<vmem>>, vector<1x8x64xbf16>
    %1 = vector.shape_cast %0 : vector<1x8x64xbf16> to vector<8x64xbf16>
    %2 = arith.extf %1 : vector<8x64xbf16> to vector<8x64xf32>
    %cst = arith.constant dense<0.000000e+00> : vector<8xf32>
    %3 = vector.multi_reduction <add>, %2, %cst [1] : vector<8x64xf32> to vector<8xf32>
    %4 = vector.shape_cast %3 : vector<8xf32> to vector<8x1xf32>
    %cst_2 = arith.constant 6.400000e+01 : f32
    %5 = vector.broadcast %cst_2 : f32 to vector<8x1xf32>
    %6 = arith.divf %4, %5 : vector<8x1xf32>
    %7 = vector.broadcast %6 : vector<8x1xf32> to vector<8x64xf32>
    %8 = arith.subf %2, %7 : vector<8x64xf32>
    %9 = arith.mulf %8, %8 : vector<8x64xf32>
    %cst_3 = arith.constant dense<0.000000e+00> : vector<8xf32>
    %10 = vector.multi_reduction <add>, %9, %cst_3 [1] : vector<8x64xf32> to vector<8xf32>
    %11 = vector.shape_cast %10 : vector<8xf32> to vector<8x1xf32>
    %cst_4 = arith.constant 6.400000e+01 : f32
    %12 = vector.broadcast %cst_4 : f32 to vector<8x1xf32>
    %13 = arith.divf %11, %12 : vector<8x1xf32>
    %14 = vector.broadcast %6 : vector<8x1xf32> to vector<8x64xf32>
    %15 = arith.subf %2, %14 : vector<8x64xf32>
    %cst_5 = arith.constant 9.99999974E-6 : f32
    %16 = vector.broadcast %cst_5 : f32 to vector<8x1xf32>
    %17 = arith.addf %13, %16 : vector<8x1xf32>
    %18 = math.rsqrt %17 : vector<8x1xf32>
    %19 = vector.broadcast %18 : vector<8x1xf32> to vector<8x64xf32>
    %20 = arith.mulf %15, %19 : vector<8x64xf32>
    %c0_6 = arith.constant 0 : index
    %c0_7 = arith.constant 0 : index
    %21 = vector.load %arg4[%c0_6, %c0_7] : memref<1x64xf32, #tpu.memory_space<vmem>>, vector<1x64xf32>
    %22 = vector.broadcast %21 : vector<1x64xf32> to vector<8x64xf32>
    %23 = arith.mulf %20, %22 : vector<8x64xf32>
    %c0_8 = arith.constant 0 : index
    %c0_9 = arith.constant 0 : index
    %24 = vector.load %arg5[%c0_8, %c0_9] : memref<1x64xf32, #tpu.memory_space<vmem>>, vector<1x64xf32>
    %25 = vector.broadcast %24 : vector<1x64xf32> to vector<8x64xf32>
    %26 = arith.addf %23, %25 : vector<8x64xf32>
    %27 = arith.truncf %26 : vector<8x64xf32> to vector<8x64xbf16>
    %c0_10 = arith.constant 0 : index
    %c0_11 = arith.constant 0 : index
    %28 = vector.load %arg6[%c0_10, %c0_11] : memref<64x192xbf16, #tpu.memory_space<vmem>>, vector<64x192xbf16>
    %cst_12 = arith.constant dense<0.000000e+00> : vector<8x192xf32>
    %29 = tpu.matmul %27, %28, %cst_12 {dimension_numbers = #tpu.dot_dimension_numbers<[1], [0], [0], [1], [0, 0, 1, 1], [], []>} : vector<8x64xbf16>, vector<64x192xbf16>, vector<8x192xf32> -> vector<8x192xf32>
    %c0_13 = arith.constant 0 : index
    %c0_14 = arith.constant 0 : index
    %30 = vector.load %arg7[%c0_13, %c0_14] : memref<1x192xf32, #tpu.memory_space<vmem>>, vector<1x192xf32>
    %31 = vector.broadcast %30 : vector<1x192xf32> to vector<8x192xf32>
    %32 = arith.addf %29, %31 : vector<8x192xf32>
    %33 = arith.truncf %32 : vector<8x192xf32> to vector<8x192xbf16>
    %34 = vector.extract_strided_slice %33 {offsets = [0, 0], sizes = [8, 64], strides = [1, 1]} : vector<8x192xbf16> to vector<8x64xbf16>
    %35 = vector.extract_strided_slice %34 {offsets = [0, 0], sizes = [8, 16], strides = [1, 1]} : vector<8x64xbf16> to vector<8x16xbf16>
    %36 = vector.extract_strided_slice %34 {offsets = [0, 16], sizes = [8, 16], strides = [1, 1]} : vector<8x64xbf16> to vector<8x16xbf16>
    %37 = vector.extract_strided_slice %34 {offsets = [0, 32], sizes = [8, 16], strides = [1, 1]} : vector<8x64xbf16> to vector<8x16xbf16>
    %38 = vector.extract_strided_slice %34 {offsets = [0, 48], sizes = [8, 16], strides = [1, 1]} : vector<8x64xbf16> to vector<8x16xbf16>
    %39 = vector.shape_cast %35 : vector<8x16xbf16> to vector<1x8x16xbf16>
    %40 = vector.shape_cast %36 : vector<8x16xbf16> to vector<1x8x16xbf16>
    %41 = vector.shape_cast %37 : vector<8x16xbf16> to vector<1x8x16xbf16>
    %42 = vector.shape_cast %38 : vector<8x16xbf16> to vector<1x8x16xbf16>
    %43 = tpu.concatenate %39, %40, %41, %42 in 0 : vector<1x8x16xbf16>, vector<1x8x16xbf16>, vector<1x8x16xbf16>, vector<1x8x16xbf16> -> vector<4x8x16xbf16>
    %44 = vector.extract_strided_slice %33 {offsets = [0, 64], sizes = [8, 64], strides = [1, 1]} : vector<8x192xbf16> to vector<8x64xbf16>
    %45 = vector.extract_strided_slice %44 {offsets = [0, 0], sizes = [8, 16], strides = [1, 1]} : vector<8x64xbf16> to vector<8x16xbf16>
    %46 = vector.extract_strided_slice %44 {offsets = [0, 16], sizes = [8, 16], strides = [1, 1]} : vector<8x64xbf16> to vector<8x16xbf16>
    %47 = vector.extract_strided_slice %44 {offsets = [0, 32], sizes = [8, 16], strides = [1, 1]} : vector<8x64xbf16> to vector<8x16xbf16>
    %48 = vector.extract_strided_slice %44 {offsets = [0, 48], sizes = [8, 16], strides = [1, 1]} : vector<8x64xbf16> to vector<8x16xbf16>
    %49 = vector.shape_cast %45 : vector<8x16xbf16> to vector<1x8x16xbf16>
    %50 = vector.shape_cast %46 : vector<8x16xbf16> to vector<1x8x16xbf16>
    %51 = vector.shape_cast %47 : vector<8x16xbf16> to vector<1x8x16xbf16>
    %52 = vector.shape_cast %48 : vector<8x16xbf16> to vector<1x8x16xbf16>
    %53 = tpu.concatenate %49, %50, %51, %52 in 0 : vector<1x8x16xbf16>, vector<1x8x16xbf16>, vector<1x8x16xbf16>, vector<1x8x16xbf16> -> vector<4x8x16xbf16>
    %54 = vector.extract_strided_slice %33 {offsets = [0, 128], sizes = [8, 64], strides = [1, 1]} : vector<8x192xbf16> to vector<8x64xbf16>
    %55 = vector.extract_strided_slice %54 {offsets = [0, 0], sizes = [8, 16], strides = [1, 1]} : vector<8x64xbf16> to vector<8x16xbf16>
    %56 = vector.extract_strided_slice %54 {offsets = [0, 16], sizes = [8, 16], strides = [1, 1]} : vector<8x64xbf16> to vector<8x16xbf16>
    %57 = vector.extract_strided_slice %54 {offsets = [0, 32], sizes = [8, 16], strides = [1, 1]} : vector<8x64xbf16> to vector<8x16xbf16>
    %58 = vector.extract_strided_slice %54 {offsets = [0, 48], sizes = [8, 16], strides = [1, 1]} : vector<8x64xbf16> to vector<8x16xbf16>
    %59 = vector.shape_cast %55 : vector<8x16xbf16> to vector<1x8x16xbf16>
    %60 = vector.shape_cast %56 : vector<8x16xbf16> to vector<1x8x16xbf16>
    %61 = vector.shape_cast %57 : vector<8x16xbf16> to vector<1x8x16xbf16>
    %62 = vector.shape_cast %58 : vector<8x16xbf16> to vector<1x8x16xbf16>
    %63 = tpu.concatenate %59, %60, %61, %62 in 0 : vector<1x8x16xbf16>, vector<1x8x16xbf16>, vector<1x8x16xbf16>, vector<1x8x16xbf16> -> vector<4x8x16xbf16>
    "tpu.trace_start"() <{level = 10 : i32, message = "hne,hme->hnm"}> : () -> ()
    %cst_15 = arith.constant dense<0.000000e+00> : vector<4x8x8xf32>
    %64 = tpu.matmul %43, %53, %cst_15 {dimension_numbers = #tpu.dot_dimension_numbers<[2], [2], [1], [1], [0, 0, 0, 1, 1, 1], [0], [0]>} : vector<4x8x16xbf16>, vector<4x8x16xbf16>, vector<4x8x8xf32> -> vector<4x8x8xf32>
    "tpu.trace_stop"() : () -> ()
    %c0_16 = arith.constant 0 : index
    %c0_17 = arith.constant 0 : index
    %c0_18 = arith.constant 0 : index
    %c0_19 = arith.constant 0 : index
    %65 = vector.load %arg3[%c0_16, %c0_17, %c0_18, %c0_19] : memref<1x4x8x8xbf16, #tpu.memory_space<vmem>>, vector<1x4x8x8xbf16>
    %66 = vector.shape_cast %65 : vector<1x4x8x8xbf16> to vector<4x8x8xbf16>
    %67 = arith.extf %66 : vector<4x8x8xbf16> to vector<4x8x8xf32>
    %68 = arith.addf %64, %67 : vector<4x8x8xf32>
    %cst_20 = arith.constant dense<0xFF800000> : vector<4x8xf32>
    %69 = vector.multi_reduction <maximumf>, %68, %cst_20 [2] : vector<4x8x8xf32> to vector<4x8xf32>
    %70 = vector.shape_cast %69 : vector<4x8xf32> to vector<4x8x1xf32>
    %71 = vector.broadcast %70 : vector<4x8x1xf32> to vector<4x8x8xf32>
    %72 = arith.subf %68, %71 : vector<4x8x8xf32>
    %73 = math.exp %72 : vector<4x8x8xf32>
    %cst_21 = arith.constant dense<0.000000e+00> : vector<4x8xf32>
    %74 = vector.multi_reduction <add>, %73, %cst_21 [2] : vector<4x8x8xf32> to vector<4x8xf32>
    %75 = vector.shape_cast %74 : vector<4x8xf32> to vector<4x8x1xf32>
    %76 = tpu.reciprocal %75 {approx = true} : vector<4x8x1xf32> -> vector<4x8x1xf32>
    %77 = vector.broadcast %76 : vector<4x8x1xf32> to vector<4x8x8xf32>
    %78 = arith.mulf %73, %77 : vector<4x8x8xf32>
    %79 = arith.truncf %78 : vector<4x8x8xf32> to vector<4x8x8xbf16>
    "tpu.trace_start"() <{level = 10 : i32, message = "hnm,hme->hne"}> : () -> ()
    %cst_22 = arith.constant dense<0.000000e+00> : vector<4x8x16xf32>
    %80 = tpu.matmul %79, %63, %cst_22 {dimension_numbers = #tpu.dot_dimension_numbers<[2], [1], [1], [2], [0, 0, 0, 1, 1, 2], [0], [0]>} : vector<4x8x8xbf16>, vector<4x8x16xbf16>, vector<4x8x16xf32> -> vector<4x8x16xf32>
    "tpu.trace_stop"() : () -> ()
    %81 = vector.extract_strided_slice %80 {offsets = [0, 0, 0], sizes = [1, 8, 16], strides = [1, 1, 1]} : vector<4x8x16xf32> to vector<1x8x16xf32>
    %82 = vector.shape_cast %81 : vector<1x8x16xf32> to vector<8x16xf32>
    %83 = vector.extract_strided_slice %80 {offsets = [1, 0, 0], sizes = [1, 8, 16], strides = [1, 1, 1]} : vector<4x8x16xf32> to vector<1x8x16xf32>
    %84 = vector.shape_cast %83 : vector<1x8x16xf32> to vector<8x16xf32>
    %85 = vector.extract_strided_slice %80 {offsets = [2, 0, 0], sizes = [1, 8, 16], strides = [1, 1, 1]} : vector<4x8x16xf32> to vector<1x8x16xf32>
    %86 = vector.shape_cast %85 : vector<1x8x16xf32> to vector<8x16xf32>
    %87 = vector.extract_strided_slice %80 {offsets = [3, 0, 0], sizes = [1, 8, 16], strides = [1, 1, 1]} : vector<4x8x16xf32> to vector<1x8x16xf32>
    %88 = vector.shape_cast %87 : vector<1x8x16xf32> to vector<8x16xf32>
    %89 = tpu.concatenate %82, %84, %86, %88 in 1 : vector<8x16xf32>, vector<8x16xf32>, vector<8x16xf32>, vector<8x16xf32> -> vector<8x64xf32>
    %90 = arith.truncf %89 : vector<8x64xf32> to vector<8x64xbf16>
    %c0_23 = arith.constant 0 : index
    %c0_24 = arith.constant 0 : index
    %91 = vector.load %arg8[%c0_23, %c0_24] : memref<64x64xbf16, #tpu.memory_space<vmem>>, vector<64x64xbf16>
    %cst_25 = arith.constant dense<0.000000e+00> : vector<8x64xf32>
    %92 = tpu.matmul %90, %91, %cst_25 {dimension_numbers = #tpu.dot_dimension_numbers<[1], [0], [0], [1], [0, 0, 1, 1], [], []>} : vector<8x64xbf16>, vector<64x64xbf16>, vector<8x64xf32> -> vector<8x64xf32>
    %93 = arith.addf %2, %92 : vector<8x64xf32>
    %c0_26 = arith.constant 0 : index
    %c0_27 = arith.constant 0 : index
    %94 = vector.load %arg9[%c0_26, %c0_27] : memref<1x64xf32, #tpu.memory_space<vmem>>, vector<1x64xf32>
    %95 = vector.broadcast %94 : vector<1x64xf32> to vector<8x64xf32>
    %96 = arith.addf %93, %95 : vector<8x64xf32>
    %97 = arith.truncf %96 : vector<8x64xf32> to vector<8x64xbf16>
    %c0_28 = arith.constant 0 : index
    %c0_29 = arith.constant 0 : index
    %98 = vector.load %arg10[%c0_28, %c0_29] : memref<64x16xbf16, #tpu.memory_space<vmem>>, vector<64x16xbf16>
    %cst_30 = arith.constant dense<0.000000e+00> : vector<8x16xf32>
    %99 = tpu.matmul %97, %98, %cst_30 {dimension_numbers = #tpu.dot_dimension_numbers<[1], [0], [0], [1], [0, 0, 1, 1], [], []>} : vector<8x64xbf16>, vector<64x16xbf16>, vector<8x16xf32> -> vector<8x16xf32>
    %c0_31 = arith.constant 0 : index
    %c0_32 = arith.constant 0 : index
    %100 = vector.load %arg24[%c0_31, %c0_32] : memref<8x16xf32, #tpu.memory_space<vmem>>, vector<8x16xf32>
    tpu.vector_store %arg24[%c0_31, %c0_32], %99 {strides = array<i32>} : memref<8x16xf32, #tpu.memory_space<vmem>>, vector<8x16xf32>,
    %c0_33 = arith.constant 0 : index
    %c0_34 = arith.constant 0 : index
    %101 = vector.load %arg11[%c0_33, %c0_34] : memref<64x16xbf16, #tpu.memory_space<vmem>>, vector<64x16xbf16>
    %cst_35 = arith.constant dense<0.000000e+00> : vector<8x16xf32>
    %102 = tpu.matmul %97, %101, %cst_35 {dimension_numbers = #tpu.dot_dimension_numbers<[1], [0], [0], [1], [0, 0, 1, 1], [], []>} : vector<8x64xbf16>, vector<64x16xbf16>, vector<8x16xf32> -> vector<8x16xf32>
    %c0_i32 = arith.constant 0 : i32
    %c1_i32 = arith.constant 1 : i32
    %103 = arith.muli %c0_i32, %c1_i32 : i32
    %c0_i32_36 = arith.constant 0 : i32
    %104 = arith.addi %c0_i32_36, %103 : i32
    %c64_i32 = arith.constant 64 : i32
    %105 = arith.muli %104, %c64_i32 : i32
    %106 = tpu.assume_multiple %105, 64 : i32
    %c8_i32 = arith.constant 8 : i32
    %107 = arith.muli %104, %c8_i32 : i32
    %108 = tpu.assume_multiple %107, 8 : i32
    %c0_37 = arith.constant 0 : index
    %109 = arith.index_cast %106 : i32 to index
    %c0_38 = arith.constant 0 : index
    %110 = vector.load %arg2[%c0_37, %109, %c0_38] : memref<1x64x16xbf16, #tpu.memory_space<vmem>>, vector<1x64x16xbf16>
    %111 = vector.shape_cast %110 : vector<1x64x16xbf16> to vector<64x16xbf16>
    %c0_39 = arith.constant 0 : index
    %c0_40 = arith.constant 0 : index
    %112 = vector.load %arg12[%c0_39, %c0_40] : memref<16x16xbf16, #tpu.memory_space<vmem>>, vector<16x16xbf16>
    %cst_41 = arith.constant dense<0.000000e+00> : vector<64x16xf32>
    %113 = tpu.matmul %111, %112, %cst_41 {dimension_numbers = #tpu.dot_dimension_numbers<[1], [0], [0], [1], [0, 0, 1, 1], [], []>} : vector<64x16xbf16>, vector<16x16xbf16>, vector<64x16xf32> -> vector<64x16xf32>
    %c0_42 = arith.constant 0 : index
    %c0_43 = arith.constant 0 : index
    %114 = vector.load %arg13[%c0_42, %c0_43] : memref<1x16xf32, #tpu.memory_space<vmem>>, vector<1x16xf32>
    %115 = vector.broadcast %114 : vector<1x16xf32> to vector<64x16xf32>
    %116 = arith.addf %113, %115 : vector<64x16xf32>
    %117 = vector.shape_cast %116 : vector<64x16xf32> to vector<8x8x16xf32>
    %118 = arith.index_cast %108 : i32 to index
    %c0_44 = arith.constant 0 : index
    %119 = vector.load %arg24[%118, %c0_44] : memref<8x16xf32, #tpu.memory_space<vmem>>, vector<8x16xf32>
    %120 = vector.shape_cast %119 : vector<8x16xf32> to vector<8x1x16xf32>
    %121 = vector.broadcast %120 : vector<8x1x16xf32> to vector<8x8x16xf32>
    %122 = arith.addf %117, %121 : vector<8x8x16xf32>
    %123 = vector.shape_cast %102 : vector<8x16xf32> to vector<1x8x16xf32>
    %124 = vector.broadcast %123 : vector<1x8x16xf32> to vector<8x8x16xf32>
    %125 = arith.addf %122, %124 : vector<8x8x16xf32>
    %126 = arith.truncf %125 : vector<8x8x16xf32> to vector<8x8x16xbf16>
    %127 = arith.mulf %126, %126 : vector<8x8x16xbf16>
    %128 = arith.mulf %126, %127 : vector<8x8x16xbf16>
    %cst_45 = arith.constant 4.467770e-02 : bf16
    %129 = vector.broadcast %cst_45 : bf16 to vector<8x8x16xbf16>
    %130 = arith.mulf %129, %128 : vector<8x8x16xbf16>
    %131 = arith.addf %126, %130 : vector<8x8x16xbf16>
    %cst_46 = arith.constant 7.968750e-01 : bf16
    %132 = vector.broadcast %cst_46 : bf16 to vector<8x8x16xbf16>
    %133 = arith.mulf %132, %131 : vector<8x8x16xbf16>
    %134 = math.tanh %133 : vector<8x8x16xbf16>
    %cst_47 = arith.constant 1.000000e+00 : bf16
    %135 = vector.broadcast %cst_47 : bf16 to vector<8x8x16xbf16>
    %136 = arith.addf %135, %134 : vector<8x8x16xbf16>
    %cst_48 = arith.constant 5.000000e-01 : bf16
    %137 = vector.broadcast %cst_48 : bf16 to vector<8x8x16xbf16>
    %138 = arith.mulf %137, %136 : vector<8x8x16xbf16>
    %139 = arith.mulf %126, %138 : vector<8x8x16xbf16>
    %140 = vector.shape_cast %139 : vector<8x8x16xbf16> to vector<64x16xbf16>
    %c0_49 = arith.constant 0 : index
    %c0_50 = arith.constant 0 : index
    %141 = vector.load %arg14[%c0_49, %c0_50] : memref<16x16xbf16, #tpu.memory_space<vmem>>, vector<16x16xbf16>
    %cst_51 = arith.constant dense<0.000000e+00> : vector<64x16xf32>
    %142 = tpu.matmul %140, %141, %cst_51 {dimension_numbers = #tpu.dot_dimension_numbers<[1], [0], [0], [1], [0, 0, 1, 1], [], []>} : vector<64x16xbf16>, vector<16x16xbf16>, vector<64x16xf32> -> vector<64x16xf32>
    %c0_52 = arith.constant 0 : index
    %c0_53 = arith.constant 0 : index
    %143 = vector.load %arg15[%c0_52, %c0_53] : memref<1x16xf32, #tpu.memory_space<vmem>>, vector<1x16xf32>
    %144 = vector.broadcast %143 : vector<1x16xf32> to vector<64x16xf32>
    %145 = arith.addf %142, %144 : vector<64x16xf32>
    %146 = arith.extf %111 : vector<64x16xbf16> to vector<64x16xf32>
    %147 = arith.addf %146, %145 : vector<64x16xf32>
    %148 = arith.truncf %147 : vector<64x16xf32> to vector<64x16xbf16>
    %c0_54 = arith.constant 0 : index
    %149 = arith.index_cast %106 : i32 to index
    %c0_55 = arith.constant 0 : index
    %150 = vector.load %arg23[%c0_54, %149, %c0_55] : memref<1x64x16xbf16, #tpu.memory_space<vmem>>, vector<1x64x16xbf16>
    %151 = vector.shape_cast %150 : vector<1x64x16xbf16> to vector<64x16xbf16>
    %152 = vector.shape_cast %148 : vector<64x16xbf16> to vector<1x64x16xbf16>
    tpu.vector_store %arg23[%c0_54, %149, %c0_55], %152 {strides = array<i32>} : memref<1x64x16xbf16, #tpu.memory_space<vmem>>, vector<1x64x16xbf16>,
    %c1_i32_56 = arith.constant 1 : i32
    %cst_57 = arith.constant dense<0.000000e+00> : vector<8xf32>
    %153 = vector.multi_reduction <add>, %96, %cst_57 [1] : vector<8x64xf32> to vector<8xf32>
    %154 = vector.shape_cast %153 : vector<8xf32> to vector<8x1xf32>
    %cst_58 = arith.constant 6.400000e+01 : f32
    %155 = vector.broadcast %cst_58 : f32 to vector<8x1xf32>
    %156 = arith.divf %154, %155 : vector<8x1xf32>
    %157 = vector.broadcast %156 : vector<8x1xf32> to vector<8x64xf32>
    %158 = arith.subf %96, %157 : vector<8x64xf32>
    %159 = arith.mulf %158, %158 : vector<8x64xf32>
    %cst_59 = arith.constant dense<0.000000e+00> : vector<8xf32>
    %160 = vector.multi_reduction <add>, %159, %cst_59 [1] : vector<8x64xf32> to vector<8xf32>
    %161 = vector.shape_cast %160 : vector<8xf32> to vector<8x1xf32>
    %cst_60 = arith.constant 6.400000e+01 : f32
    %162 = vector.broadcast %cst_60 : f32 to vector<8x1xf32>
    %163 = arith.divf %161, %162 : vector<8x1xf32>
    %164 = vector.broadcast %156 : vector<8x1xf32> to vector<8x64xf32>
    %165 = arith.subf %96, %164 : vector<8x64xf32>
    %cst_61 = arith.constant 9.99999974E-6 : f32
    %166 = vector.broadcast %cst_61 : f32 to vector<8x1xf32>
    %167 = arith.addf %163, %166 : vector<8x1xf32>
    %168 = math.rsqrt %167 : vector<8x1xf32>
    %169 = vector.broadcast %168 : vector<8x1xf32> to vector<8x64xf32>
    %170 = arith.mulf %165, %169 : vector<8x64xf32>
    %c0_62 = arith.constant 0 : index
    %c0_63 = arith.constant 0 : index
    %171 = vector.load %arg16[%c0_62, %c0_63] : memref<1x64xf32, #tpu.memory_space<vmem>>, vector<1x64xf32>
    %172 = vector.broadcast %171 : vector<1x64xf32> to vector<8x64xf32>
    %173 = arith.mulf %170, %172 : vector<8x64xf32>
    %c0_64 = arith.constant 0 : index
    %c0_65 = arith.constant 0 : index
    %174 = vector.load %arg17[%c0_64, %c0_65] : memref<1x64xf32, #tpu.memory_space<vmem>>, vector<1x64xf32>
    %175 = vector.broadcast %174 : vector<1x64xf32> to vector<8x64xf32>
    %176 = arith.addf %173, %175 : vector<8x64xf32>
    %177 = arith.truncf %176 : vector<8x64xf32> to vector<8x64xbf16>
    %c0_66 = arith.constant 0 : index
    %c0_67 = arith.constant 0 : index
    %178 = vector.load %arg18[%c0_66, %c0_67] : memref<64x512xbf16, #tpu.memory_space<vmem>>, vector<64x512xbf16>
    %cst_68 = arith.constant dense<0.000000e+00> : vector<8x512xf32>
    %179 = tpu.matmul %177, %178, %cst_68 {dimension_numbers = #tpu.dot_dimension_numbers<[1], [0], [0], [1], [0, 0, 1, 1], [], []>} : vector<8x64xbf16>, vector<64x512xbf16>, vector<8x512xf32> -> vector<8x512xf32>
    %c0_69 = arith.constant 0 : index
    %c0_70 = arith.constant 0 : index
    %180 = vector.load %arg19[%c0_69, %c0_70] : memref<1x512xf32, #tpu.memory_space<vmem>>, vector<1x512xf32>
    %181 = vector.broadcast %180 : vector<1x512xf32> to vector<8x512xf32>
    %182 = arith.addf %179, %181 : vector<8x512xf32>
    %183 = vector.extract_strided_slice %182 {offsets = [0, 0], sizes = [8, 256], strides = [1, 1]} : vector<8x512xf32> to vector<8x256xf32>
    %184 = arith.mulf %183, %183 : vector<8x256xf32>
    %185 = arith.mulf %183, %184 : vector<8x256xf32>
    %cst_71 = arith.constant 4.471500e-02 : f32
    %186 = vector.broadcast %cst_71 : f32 to vector<8x256xf32>
    %187 = arith.mulf %186, %185 : vector<8x256xf32>
    %188 = arith.addf %183, %187 : vector<8x256xf32>
    %cst_72 = arith.constant 0.797884583 : f32
    %189 = vector.broadcast %cst_72 : f32 to vector<8x256xf32>
    %190 = arith.mulf %189, %188 : vector<8x256xf32>
    %191 = math.tanh %190 : vector<8x256xf32>
    %cst_73 = arith.constant 1.000000e+00 : f32
    %192 = vector.broadcast %cst_73 : f32 to vector<8x256xf32>
    %193 = arith.addf %192, %191 : vector<8x256xf32>
    %cst_74 = arith.constant 5.000000e-01 : f32
    %194 = vector.broadcast %cst_74 : f32 to vector<8x256xf32>
    %195 = arith.mulf %194, %193 : vector<8x256xf32>
    %196 = arith.mulf %183, %195 : vector<8x256xf32>
    %197 = vector.extract_strided_slice %182 {offsets = [0, 256], sizes = [8, 256], strides = [1, 1]} : vector<8x512xf32> to vector<8x256xf32>
    %198 = arith.mulf %196, %197 : vector<8x256xf32>
    %199 = arith.truncf %198 : vector<8x256xf32> to vector<8x256xbf16>
    %c0_75 = arith.constant 0 : index
    %c0_76 = arith.constant 0 : index
    %200 = vector.load %arg20[%c0_75, %c0_76] : memref<256x64xbf16, #tpu.memory_space<vmem>>, vector<256x64xbf16>
    %cst_77 = arith.constant dense<0.000000e+00> : vector<8x64xf32>
    %201 = tpu.matmul %199, %200, %cst_77 {dimension_numbers = #tpu.dot_dimension_numbers<[1], [0], [0], [1], [0, 0, 1, 1], [], []>} : vector<8x256xbf16>, vector<256x64xbf16>, vector<8x64xf32> -> vector<8x64xf32>
    %202 = arith.addf %96, %201 : vector<8x64xf32>
    %c0_78 = arith.constant 0 : index
    %c0_79 = arith.constant 0 : index
    %203 = vector.load %arg21[%c0_78, %c0_79] : memref<1x64xf32, #tpu.memory_space<vmem>>, vector<1x64xf32>
    %204 = vector.broadcast %203 : vector<1x64xf32> to vector<8x64xf32>
    %205 = arith.addf %202, %204 : vector<8x64xf32>
    %206 = arith.truncf %205 : vector<8x64xf32> to vector<8x64xbf16>
    %c0_80 = arith.constant 0 : index
    %c0_81 = arith.constant 0 : index
    %c0_82 = arith.constant 0 : index
    %207 = vector.load %arg22[%c0_80, %c0_81, %c0_82] : memref<1x8x64xbf16, #tpu.memory_space<vmem>>, vector<1x8x64xbf16>
    %208 = vector.shape_cast %207 : vector<1x8x64xbf16> to vector<8x64xbf16>
    %209 = vector.shape_cast %206 : vector<8x64xbf16> to vector<1x8x64xbf16>
    tpu.vector_store %arg22[%c0_80, %c0_81, %c0_82], %209 {strides = array<i32>} : memref<1x8x64xbf16, #tpu.memory_space<vmem>>, vector<1x8x64xbf16>,
    return
  }
  func.func @transform_0(%arg0: i32) -> (i32, i32, i32) {
    %c0_i32 = arith.constant 0 : i32
    %c0_i32_0 = arith.constant 0 : i32
    %c0_i32_1 = arith.constant 0 : i32
    return %arg0, %c0_i32, %c0_i32_0 : i32, i32, i32
  }
  func.func @transform_1(%arg0: i32) -> (i32, i32, i32) {
    %c0_i32 = arith.constant 0 : i32
    %c0_i32_0 = arith.constant 0 : i32
    %c0_i32_1 = arith.constant 0 : i32
    return %arg0, %c0_i32, %c0_i32_0 : i32, i32, i32
  }
  func.func @transform_2(%arg0: i32) -> (i32, i32, i32, i32) {
    %c0_i32 = arith.constant 0 : i32
    %c0_i32_0 = arith.constant 0 : i32
    %c0_i32_1 = arith.constant 0 : i32
    %c0_i32_2 = arith.constant 0 : i32
    return %arg0, %c0_i32, %c0_i32_0, %c0_i32_1 : i32, i32, i32, i32
  }
  func.func @transform_3(%arg0: i32) -> (i32, i32) {
    %c0_i32 = arith.constant 0 : i32
    %c0_i32_0 = arith.constant 0 : i32
    %c0_i32_1 = arith.constant 0 : i32
    return %c0_i32, %c0_i32_0 : i32, i32
  }
  func.func @transform_4(%arg0: i32) -> (i32, i32) {
    %c0_i32 = arith.constant 0 : i32
    %c0_i32_0 = arith.constant 0 : i32
    %c0_i32_1 = arith.constant 0 : i32
    return %c0_i32, %c0_i32_0 : i32, i32
  }
  func.func @transform_5(%arg0: i32) -> (i32, i32) {
    %c0_i32 = arith.constant 0 : i32
    %c0_i32_0 = arith.constant 0 : i32
    %c0_i32_1 = arith.constant 0 : i32
    return %c0_i32, %c0_i32_0 : i32, i32
  }
  func.func @transform_6(%arg0: i32) -> (i32, i32) {
    %c0_i32 = arith.constant 0 : i32
    %c0_i32_0 = arith.constant 0 : i32
    %c0_i32_1 = arith.constant 0 : i32
    return %c0_i32, %c0_i32_0 : i32, i32
  }
  func.func @transform_7(%arg0: i32) -> (i32, i32) {
    %c0_i32 = arith.constant 0 : i32
    %c0_i32_0 = arith.constant 0 : i32
    %c0_i32_1 = arith.constant 0 : i32
    return %c0_i32, %c0_i32_0 : i32, i32
  }
  func.func @transform_8(%arg0: i32) -> (i32, i32) {
    %c0_i32 = arith.constant 0 : i32
    %c0_i32_0 = arith.constant 0 : i32
    %c0_i32_1 = arith.constant 0 : i32
    return %c0_i32, %c0_i32_0 : i32, i32
  }
  func.func @transform_9(%arg0: i32) -> (i32, i32) {
    %c0_i32 = arith.constant 0 : i32
    %c0_i32_0 = arith.constant 0 : i32
    %c0_i32_1 = arith.constant 0 : i32
    return %c0_i32, %c0_i32_0 : i32, i32
  }
  func.func @transform_10(%arg0: i32) -> (i32, i32) {
    %c0_i32 = arith.constant 0 : i32
    %c0_i32_0 = arith.constant 0 : i32
    %c0_i32_1 = arith.constant 0 : i32
    return %c0_i32, %c0_i32_0 : i32, i32
  }
  func.func @transform_11(%arg0: i32) -> (i32, i32) {
    %c0_i32 = arith.constant 0 : i32
    %c0_i32_0 = arith.constant 0 : i32
    %c0_i32_1 = arith.constant 0 : i32
    return %c0_i32, %c0_i32_0 : i32, i32
  }
  func.func @transform_12(%arg0: i32) -> (i32, i32) {
    %c0_i32 = arith.constant 0 : i32
    %c0_i32_0 = arith.constant 0 : i32
    %c0_i32_1 = arith.constant 0 : i32
    return %c0_i32, %c0_i32_0 : i32, i32
  }
  func.func @transform_13(%arg0: i32) -> (i32, i32) {
    %c0_i32 = arith.constant 0 : i32
    %c0_i32_0 = arith.constant 0 : i32
    %c0_i32_1 = arith.constant 0 : i32
    return %c0_i32, %c0_i32_0 : i32, i32
  }
  func.func @transform_14(%arg0: i32) -> (i32, i32) {
    %c0_i32 = arith.constant 0 : i32
    %c0_i32_0 = arith.constant 0 : i32
    %c0_i32_1 = arith.constant 0 : i32
    return %c0_i32, %c0_i32_0 : i32, i32
  }
  func.func @transform_15(%arg0: i32) -> (i32, i32) {
    %c0_i32 = arith.constant 0 : i32
    %c0_i32_0 = arith.constant 0 : i32
    %c0_i32_1 = arith.constant 0 : i32
    return %c0_i32, %c0_i32_0 : i32, i32
  }
  func.func @transform_16(%arg0: i32) -> (i32, i32) {
    %c0_i32 = arith.constant 0 : i32
    %c0_i32_0 = arith.constant 0 : i32
    %c0_i32_1 = arith.constant 0 : i32
    return %c0_i32, %c0_i32_0 : i32, i32
  }
  func.func @transform_17(%arg0: i32) -> (i32, i32) {
    %c0_i32 = arith.constant 0 : i32
    %c0_i32_0 = arith.constant 0 : i32
    %c0_i32_1 = arith.constant 0 : i32
    return %c0_i32, %c0_i32_0 : i32, i32
  }
  func.func @transform_18(%arg0: i32) -> (i32, i32) {
    %c0_i32 = arith.constant 0 : i32
    %c0_i32_0 = arith.constant 0 : i32
    %c0_i32_1 = arith.constant 0 : i32
    return %c0_i32, %c0_i32_0 : i32, i32
  }
  func.func @transform_19(%arg0: i32) -> (i32, i32) {
    %c0_i32 = arith.constant 0 : i32
    %c0_i32_0 = arith.constant 0 : i32
    %c0_i32_1 = arith.constant 0 : i32
    return %c0_i32, %c0_i32_0 : i32, i32
  }
  func.func @transform_20(%arg0: i32) -> (i32, i32) {
    %c0_i32 = arith.constant 0 : i32
    %c0_i32_0 = arith.constant 0 : i32
    %c0_i32_1 = arith.constant 0 : i32
    return %c0_i32, %c0_i32_0 : i32, i32
  }
  func.func @transform_21(%arg0: i32) -> (i32, i32, i32) {
    %c0_i32 = arith.constant 0 : i32
    %c0_i32_0 = arith.constant 0 : i32
    %c0_i32_1 = arith.constant 0 : i32
    return %arg0, %c0_i32, %c0_i32_0 : i32, i32, i32
  }
  func.func @transform_22(%arg0: i32) -> (i32, i32, i32) {
    %c0_i32 = arith.constant 0 : i32
    %c0_i32_0 = arith.constant 0 : i32
    %c0_i32_1 = arith.constant 0 : i32
    return %arg0, %c0_i32, %c0_i32_0 : i32, i32, i32
  }
}

</mosaic_0001>

<bundles_post_ra>
// kernel: sg2sc_forward.2
= control target key start
LH: loop header
LB: loop body
LE: loop exit
PB: predicated region body
PF: predicated region fallthrough
CT: control target
= control target key end

     0   :  { %s3644_s0 = inlined_call_operand.vmem [shape: bf16[2,8,64], index: 0, kind: input, shape index: {}, may-alias: {0,21}]   ;;  %s3645_s1 = inlined_call_operand.vmem [shape: bf16[2,64,16], index: 1, kind: input, shape index: {}, may-alias: {1,22}]   ;;  %s3646_s2 = inlined_call_operand.vmem [shape: bf16[2,4,8,8], index: 2, kind: input, shape index: {}]   ;;  %s3647_s3 = inlined_call_operand.vmem [shape: f32[1,64], index: 3, kind: input, shape index: {}]   ;;  %s3648_s4 = inlined_call_operand.vmem [shape: f32[1,64], index: 4, kind: input, shape index: {}]   ;;  %s3649_s5 = inlined_call_operand.vmem [shape: bf16[64,192], index: 5, kind: input, shape index: {}]   ;;  %s3650_s6 = inlined_call_operand.vmem [shape: f32[1,192], index: 6, kind: input, shape index: {}]   ;;  %s3651_s7 = inlined_call_operand.vmem [shape: bf16[64,64], index: 7, kind: input, shape index: {}]   ;;  %s3652_s8 = inlined_call_operand.vmem [shape: f32[1,64], index: 8, kind: input, shape index: {}]   ;;  %s3653_s9 = inlined_call_operand.vmem [shape: bf16[64,16], index: 9, kind: input, shape index: {}]   ;;  %s3654_s10 = inlined_call_operand.vmem [shape: bf16[64,16], index: 10, kind: input, shape index: {}]   ;;  %s3655_s11 = inlined_call_operand.vmem [shape: bf16[16,16], index: 11, kind: input, shape index: {}]   ;;  %s3656_s12 = inlined_call_operand.vmem [shape: f32[1,16], index: 12, kind: input, shape index: {}]   ;;  %s3657_s13 = inlined_call_operand.vmem [shape: bf16[16,16], index: 13, kind: input, shape index: {}]   ;;  %s3658_s14 = inlined_call_operand.vmem [shape: f32[1,16], index: 14, kind: input, shape index: {}]   ;;  %s3659_s15 = inlined_call_operand.vmem [shape: f32[1,64], index: 15, kind: input, shape index: {}]   ;;  %s3660_s16 = inlined_call_operand.vmem [shape: f32[1,64], index: 16, kind: input, shape index: {}]   ;;  %s3661_s17 = inlined_call_operand.vmem [shape: bf16[64,512], index: 17, kind: input, shape index: {}]   ;;  %s3662_s18 = inlined_call_operand.vmem [shape: f32[1,512], index: 18, kind: input, shape index: {}]   ;;  %s3663_s19 = inlined_call_operand.vmem [shape: bf16[256,64], index: 19, kind: input, shape index: {}]   ;;  %s3664_s20 = inlined_call_operand.vmem [shape: f32[1,64], index: 20, kind: input, shape index: {}]   ;;  %s3665_s21 = inlined_call_operand.vmem [shape: bf16[2,8,64], index: 21, kind: output, shape index: {0}, may-alias: {0,21}]   ;;  %s3666_s22 = inlined_call_operand.vmem [shape: bf16[2,64,16], index: 22, kind: output, shape index: {1}, may-alias: {1,22}]  }
   0x1   :  { %3668 = sst [smem:[#allocation3_spill]] %s3644_s0 }
   0x2   :  { %3669 = sst [smem:[#allocation4_spill]] %s3645_s1 }
   0x3   :  { %3670 = sst [smem:[#allocation5_spill]] %s3646_s2 }
   0x4   :  { %3671 = sst [smem:[#allocation6_spill]] %s3647_s3  ;;  %s3168_s3 = smov 0  }
   0x5   :  { %3672 = sst [smem:[#allocation7_spill]] %s3648_s4 }
   0x6   :  { %3673 = sst [smem:[#allocation8_spill]] %s3649_s5 }
   0x7   :  { %3674 = sst [smem:[#allocation9_spill]] %s3650_s6 }
   0x8 LB: > { %s2598_s28 = sadd.s32 4294967295, %s3040_s3   ;;  %p2602_p0 = scmp.ge.s32.totalorder %s3040_s3, 1  ;;  %s3040_s3 = sphi %s3168_s3, %s33_s3  }
   0x9   : > { %p634_p1 = scmp.lt.s32.totalorder %s3040_s3, 3 }
   0xb   : > { %p635_p2 = pnand %p2602_p0, %p634_p1 }
   0xc   : > { %p709_p3 = scmp.lt.s32.totalorder (!%p635_p2), %s2598_s28, 1  ;;  %s3675_s0 = sld [smem:[#allocation3_spill]] (!%p635_p2) }
   0xd   : > { %638 = sbr.rel (%p635_p2) target bundleno = 2540 (0x9ec), region = 104  ;;  %s3676_s24 = sld [smem:[#allocation8_spill]] (!%p635_p2) }
   0xe   : > { %s3677_s30 = sld [smem:[#allocation6_spill]] (!%p635_p2)  ;;  %s3045_s25 = smov (!%p635_p2), 80  }
   0xf   : > { %s3679_s6 = sld [smem:[#allocation9_spill]] (!%p635_p2)  ;;  %s3046_s26 = smov (!%p635_p2), 112  }
  0x10   : > { %s3047_s2 = smov (!%p635_p2), 96   ;;  %s3048_s27 = smov (!%p635_p2), 64  }
  0x12   : > { %s3683_s28 = smov (!%p709_p3, %s2598_s28), 1  ;;  %vm739_vm0 = vcmask 523264   ;;  %v3042_v12 = vmov 0   ;;  %v781_v27 = vlaneseq  ;;  %v3043_v33 = vmov 0.0  }
  0x13   : > { %s2603_s29 = sshll.u32 %s3683_s28, 2  ;;  %v2919_v8 = vld [vmem:[%s3676_s24 + $0x34] ss:$8 sps:$4 sm:$0xff]   ;;  %v2921_v9 = vld [vmem:[%s3676_s24 + $0x30] ss:$8 sps:$4 sm:$0xff]   ;;  %866 = vmatprep.mubr.bf16.mxu0 %v3042_v12  ;;  %2802 = vmatprep.subr.bf16.mxu1 %v3043_v33  ;;  %vm3044_vm1 = vmmov 0  }
  0x14   : > { %s712_s23 = scalar_lea.vmem %s3675_s0, %s2603_s29  ;;  %v2922_v10 = vld [vmem:[%s3676_s24 + $0x24] ss:$8 sps:$4 sm:$0xff]   ;;  %842 = vmatprep.subr.bf16.mxu0 %v2919_v8  ;;  %v2924_v11 = vld [vmem:[%s3676_s24 + $0x20] ss:$8 sps:$4 sm:$0xff]   ;;  %v2925_v13 = vld [vmem:[%s3676_s24 + $0x14] ss:$8 sps:$4 sm:$0xff]   ;;  %2804 = vmatprep.mubr.msk.bf16.mxu1 %vm3044_vm1, %v3043_v33 }
  0x15   : > { %v737_v0 = vld [vmem:[%s712_s23] sm:$0xf]  ;;  %843 = vmatpush1.bf16.msra.mxu0 %v2921_v9  ;;  %v2927_v14 = vld [vmem:[%s3676_s24 + $0x10] ss:$8 sps:$4 sm:$0xff]   ;;  %v2928_v15 = vld [vmem:[%s3676_s24 + $0x4] ss:$8 sps:$4 sm:$0xff]  }
  0x16   : > { %v3184_v1 = vunpack.c.l.bf16 %v737_v0  ;;  %844 = vmatprep.subr.bf16.mxu0 %v2922_v10  ;;  %v2930_v16 = vld [vmem:[%s3676_s24] ss:$8 sps:$4 sm:$0xff]   ;;  %s3678_s23 = sld [smem:[#allocation7_spill]]  ;;  %v3222_v28 = vshrl.u32 %v781_v27, 7  ;;  %vm901_vm2 = vcmask 130048   ;;  %vm1144_vm3 = vcmask 1043456  }
  0x17   : > { %v2611_v21 = vld [vmem:[%s3677_s30] ss:$0 sm:$0xff]  ;;  %s2714_s30 = sshll.u32 %s3683_s28, 4  ;;  %vm1092_vm4 = vcmask 64512   ;;  %vm1339_vm5 = vcmask 261120   ;;  %vm1341_vm6 = vcmask 392192  }
  0x18   : > { %v740_v2 = vsel %vm739_vm0, %v3184_v1, 0.0  ;;  %v3225_v29 = vsub.s32 0, %v3222_v28  ;;  %v779_v30 = vld [vmem:[%s3679_s6] sm:$0x3]  ;;  %v787_v44 = vsub.s32 1, %v3222_v28  ;;  %s2713_s4 = sshll.u32 %s3683_s28, 5 }
  0x19   : > { %741 = vadd.xlane.f32.xlu0 %v740_v2  ;;  %845 = vmatpush1.bf16.msra.mxu0 %v2924_v11  ;;  %vm2044_vm7 = vcmask 125952   ;;  %vm2486_vm8 = vcmask 519168  }
  0x1a   : > { %846 = vmatprep.subr.bf16.mxu0 %v2925_v13  ;;  %v784_v31 = vrot.slane %v779_v30, %v3225_v29  ;;  %v788_v46 = vrot.slane %v779_v30, %v787_v44 }
  0x1c   : > { %v2612_v23 = vld [vmem:[%s3678_s23] ss:$0 sm:$0xff]  ;;  %s3680_s23 = sld [smem:[#allocation5_spill]] }
  0x1d   : > { %847 = vmatpush1.bf16.msra.mxu0 %v2927_v14 }
  0x1e   : > { %848 = vmatprep.subr.bf16.mxu0 %v2928_v15 }
  0x21   : > { %849 = vmatpush1.bf16.msra.mxu0 %v2930_v16 }
  0x22   : > { %2796 = vmatprep.subr.bf16.mxu0 %v3043_v33  ;;  %s722_s1 = scalar_lea.vmem %s3680_s23, %s2714_s30 }
  0x23   : > { %v2725_v55 = vld [vmem:[%s722_s1] sm:$0xff]   ;;  %v2732_v0 = vld [vmem:[%s722_s1 + $0x8] sm:$0xff]   ;;  %s3049_s1 = smov 16  }
  0x24   : > { %v2726_v56 = vunpack.c.l.bf16 %v2725_v55  ;;  %v2727_v63 = vunpack.c.h.bf16 %v2725_v55  ;;  %v2731_v10 = vunpack.c.h.bf16 %v2732_v0 }
  0xa2   : > { %v742_v3 = vpop.xlane.xlu0 %741 }
  0xa3   : > { %v744_v4 = vmul.f32 0.015625, %v742_v3 }
  0xa5   : > { %v745_v5 = vsub.f32 %v3184_v1, %v744_v4  ;;  %v2730_v4 = vunpack.c.l.bf16 %v2732_v0 }
  0xa7   : > { %v746_v6 = vmul.f32 %v745_v5, %v745_v5 }
  0xa9   : > { %v747_v7 = vsel %vm739_vm0, %v746_v6, 0.0 }
  0xaa   : > { %748 = vadd.xlane.f32.xlu0 %v747_v7 }
 0x133   : > { %v749_v17 = vpop.xlane.xlu0 %748 }
 0x134   : > { %v750_v18 = vmul.f32 0.015625, %v749_v17 }
 0x136   : > { %v751_v19 = vadd.f32 1e-05, %v750_v18 }
 0x138   : > { %2994 = vrsqrt.f32 %v751_v19 }
 0x145   : > { %v2995_v20 = vpop.eup %2994 }
 0x146   : > { %v753_v22 = vmul.f32 %v2995_v20, %v745_v5 }
 0x148   : > { %v761_v24 = vmul.f32 %v2611_v21, %v753_v22 }
 0x14a   : > { %v769_v25 = vadd.f32 %v2612_v23, %v761_v24 }
 0x14c   : > { %v770_v26 = vpack.c.bf16 %v769_v25, %v769_v25 }
 0x14e   : > { %2621 = vmatmul.mubr.msk.bf16.vlgmr.msra.gmra.mxu0 %vm739_vm0, %v770_v26 }
 0x14f   : > { %2798 = vmatprep.mubr.msk.bf16.mxu0 %vm3044_vm1, %v3043_v33 }
 0x20e   : > { %v868_v32 = vpop.f32.mrf.mxu0 }
 0x20f   : > { %v869_v34 = vadd.f32 %v868_v32, %v784_v31 }
 0x210   : > { %v870_v35 = vpop.f32.mrf.mxu0 }
 0x211   : > { %v875_v36 = vpack.c.bf16 %v869_v34, %v869_v34  ;;  %v871_v49 = vadd.f32 %v870_v35, %v788_v46 }
 0x212   : > { %v872_v37 = vpop.f32.mrf.mxu0 }
 0x213   : > { %882 = vrot.lane.b32.xlu0 %v875_v36, %s3045_s25  ;;  %878 = vrot.lane.b32.xlu1 %v875_v36, %s3046_s26  ;;  %v3252_v52 = vpack.c.bf16 %v871_v49, %v871_v49 }
 0x214   : > { %v873_v38 = vpop.f32.mrf.mxu0 }
 0x215   : > { %v1146_v54 = vsel %vm1144_vm3, %v3252_v52, 0 }
 0x217   : > { %880 = vrot.lane.b32.xlu1 %v875_v36, %s3047_s2 }
 0x21b   : > { %899 = vrot.lane.b32.xlu1 %v875_v36, %s3048_s27 }
 0x285   : > { %v879_v39 = vpop.permute.xlu1 %878  ;;  %v883_v41 = vpop.permute.xlu0 %882 }
 0x286   : > { %948 = vrot.lane.b32.xlu1 %v879_v39, %s3048_s27 }
 0x289   : > { %v881_v40 = vpop.permute.xlu1 %880 }
 0x28a   : > { %996 = vrot.lane.b32.xlu1 %v881_v40, %s3048_s27 }
 0x28d   : > { %v900_v42 = vpop.permute.xlu1 %899 }
 0x28e   : > { %v906_v43 = vsel %vm901_vm2, %v900_v42, 0  ;;  %1044 = vrot.lane.b32.xlu1 %v883_v41, %s3048_s27  ;;  %s726_s27 = scalar_lea.vmem %s3665_s21, %s2603_s29 }
 0x28f   : > { %2797 = vmatpush3.bf16.xpose.msra.mxu0 %v906_v43 }
 0x290   : > { %2808 = vmatprep.subr.bf16.mxu0 %v3043_v33 }
 0x296   : > { %2799 = vmatmul.mubr.msk.bf16.vlgmr.msra.gmra.mxu0 %vm901_vm2, %v875_v36 }
 0x297   : > { %2810 = vmatprep.mubr.msk.bf16.mxu0 %vm3044_vm1, %v3043_v33 }
 0x2f8   : > { %v949_v45 = vpop.permute.xlu1 %948 }
 0x2f9   : > { %v954_v47 = vsel %vm901_vm2, %v949_v45, 0 }
 0x2fa   : > { %2803 = vmatpush3.bf16.xpose.msra.mxu1 %v954_v47 }
 0x2fb   : > { %2814 = vmatprep.subr.bf16.mxu1 %v3043_v33 }
 0x2fc   : > { %v997_v48 = vpop.permute.xlu1 %996 }
 0x2fd   : > { %v1002_v50 = vsel %vm901_vm2, %v997_v48, 0 }
 0x2fe   : > { %2809 = vmatpush3.bf16.xpose.msra.mxu0 %v1002_v50 }
 0x2ff   : > { %2820 = vmatprep.subr.bf16.mxu0 %v3043_v33 }
 0x300   : > { %v1045_v51 = vpop.permute.xlu1 %1044 }
 0x301   : > { %v1050_v53 = vsel %vm901_vm2, %v1045_v51, 0  ;;  %2805 = vmatmul.mubr.msk.bf16.vlgmr.msra.gmra.mxu1 %vm901_vm2, %v879_v39 }
 0x302   : > { %2815 = vmatpush3.bf16.xpose.msra.mxu1 %v1050_v53  ;;  %2816 = vmatprep.mubr.msk.bf16.mxu1 %vm3044_vm1, %v3043_v33 }
 0x303   : > { %2826 = vmatprep.subr.bf16.mxu1 %v3043_v33 }
 0x305   : > { %2811 = vmatmul.mubr.msk.bf16.vlgmr.msra.gmra.mxu0 %vm901_vm2, %v881_v40 }
 0x306   : > { %2821 = vmatpush3.bf16.msra.mxu0 %v1146_v54  ;;  %2822 = vmatprep.mubr.msk.bf16.mxu0 %vm3044_vm1, %v3043_v33 }
 0x307   : > { %2832 = vmatprep.subr.bf16.mxu0 %v3043_v33 }
 0x309   : > { %2817 = vmatmul.mubr.msk.bf16.vlgmr.msra.gmra.mxu1 %vm901_vm2, %v883_v41 }
 0x30a   : > { %2828 = vmatprep.mubr.msk.bf16.mxu1 %vm3044_vm1, %v3043_v33 }
 0x356   : > { %v942_v57 = vpop.f32.mrf.mxu0 }
 0x357   : > { %v943_v58 = vadd.f32 %v2726_v56, %v942_v57 }
 0x358   : > { %v2800_v59 = vpop.f32.mrf.mxu0 }
 0x359   : > { %v1093_v60 = vsel %vm1092_vm4, %v943_v58, -inf }
 0x35a   : > { %1094 = vmax.xlane.f32.xlu1 %v1093_v60  ;;  %v945_v61 = vpop.f32.mrf.mxu0 }
 0x35c   : > { %v2801_v62 = vpop.f32.mrf.mxu0 }
 0x3c1   : > { %v990_v2 = vpop.f32.mrf.mxu1 }
 0x3c2   : > { %v991_v3 = vadd.f32 %v2727_v63, %v990_v2 }
 0x3c3   : > { %v2806_v5 = vpop.f32.mrf.mxu1 }
 0x3c4   : > { %v1096_v6 = vsel %vm1092_vm4, %v991_v3, -inf }
 0x3c5   : > { %1097 = vmax.xlane.f32.xlu0 %v1096_v6  ;;  %v993_v7 = vpop.f32.mrf.mxu1  ;;  %v1038_v8 = vpop.f32.mrf.mxu0  ;;  %v2931_v6 = vld [vmem:[%s3651_s7 + $0x18] sm:$0xff]  }
 0x3c6   : > { %v1039_v9 = vadd.f32 %v2730_v4, %v1038_v8 }
 0x3c7   : > { %v2807_v11 = vpop.f32.mrf.mxu1  ;;  %v2812_v13 = vpop.f32.mrf.mxu0 }
 0x3c8   : > { %v1099_v14 = vsel %vm1092_vm4, %v1039_v9, -inf  ;;  %v2932_v11 = vld [vmem:[%s3651_s7 + $0x10] sm:$0xff]   ;;  %v2933_v13 = vld [vmem:[%s3651_s7 + $0x8] sm:$0xff]  }
 0x3c9   : > { %1100 = vmax.xlane.f32.xlu1 %v1099_v14  ;;  %v1041_v15 = vpop.f32.mrf.mxu0  ;;  %v1086_v16 = vpop.f32.mrf.mxu1  ;;  %v2934_v14 = vld [vmem:[%s3651_s7] sm:$0xff]  }
 0x3ca   : > { %v1087_v17 = vadd.f32 %v2731_v10, %v1086_v16  ;;  %v2935_v15 = vld [vmem:[%s3653_s9 + $0x18] sm:$0xff]  }
 0x3cb   : > { %v2813_v18 = vpop.f32.mrf.mxu0  ;;  %v2818_v19 = vpop.f32.mrf.mxu1 }
 0x3cc   : > { %v1102_v20 = vsel %vm1092_vm4, %v1087_v17, -inf }
 0x3cd   : > { %1103 = vmax.xlane.f32.xlu0 %v1102_v20  ;;  %v1089_v21 = vpop.f32.mrf.mxu1 }
 0x3cf   : > { %v2819_v22 = vpop.f32.mrf.mxu1 }
 0x3da   : > { %885 = vrot.lane.b32.xlu1 %v3252_v52, %s3046_s26  ;;  %s3051_s26 = smov 48  }
 0x3e3   : > { %v1095_v23 = vpop.xlane.xlu1 %1094 }
 0x3e4   : > { %v1105_v24 = vsub.f32 %v943_v58, %v1095_v23 }
 0x3e6   : > { %v1109_v25 = vmul.f32 1.442695, %v1105_v24 }
 0x3e8   : > { %2996 = vpow2.f32 %v1109_v25 }
 0x3f5   : > { %v2997_v26 = vpop.eup %2996 }
 0x3f6   : > { %v1117_v27 = vsel %vm1092_vm4, %v2997_v26, 0.0 }
 0x3fe   : > { %1118 = vadd.xlane.f32.xlu1 %v1117_v27 }
 0x44e   : > { %v1098_v30 = vpop.xlane.xlu0 %1097 }
 0x44f   : > { %v1106_v31 = vsub.f32 %v991_v3, %v1098_v30 }
 0x451   : > { %v1111_v32 = vmul.f32 1.442695, %v1106_v31 }
 0x452   : > { %v1101_v34 = vpop.xlane.xlu1 %1100 }
 0x453   : > { %2998 = vpow2.f32 %v1111_v32  ;;  %v1107_v35 = vsub.f32 %v1039_v9, %v1101_v34 }
 0x455   : > { %v1113_v36 = vmul.f32 1.442695, %v1107_v35 }
 0x456   : > { %v1104_v37 = vpop.xlane.xlu0 %1103  ;;  %v886_v38 = vpop.permute.xlu1 %885 }
 0x457   : > { %3000 = vpow2.f32 %v1113_v36  ;;  %v1108_v39 = vsub.f32 %v1087_v17, %v1104_v37  ;;  %v1192_v40 = vsel %vm1144_vm3, %v886_v38, 0  ;;  %v2937_v17 = vld [vmem:[%s3653_s9 + $0x10] sm:$0xff]   ;;  %v2936_v38 = vld [vmem:[%s3654_s10 + $0x18] sm:$0xff]  }
 0x458   : > { %2827 = vmatpush3.bf16.msra.mxu1 %v1192_v40  ;;  %v2938_v40 = vld [vmem:[%s3654_s10 + $0x10] sm:$0xff]  }
 0x459   : > { %v1115_v41 = vmul.f32 1.442695, %v1108_v39  ;;  %2838 = vmatprep.subr.bf16.mxu1 %v3043_v33 }
 0x45b   : > { %3002 = vpow2.f32 %v1115_v41  ;;  %v2939_v41 = vld [vmem:[%s3653_s9 + $0x8] sm:$0xff]  }
 0x460   : > { %v2999_v42 = vpop.eup %2998 }
 0x461   : > { %v1120_v43 = vsel %vm1092_vm4, %v2999_v42, 0.0 }
 0x462   : > { %1121 = vadd.xlane.f32.xlu0 %v1120_v43  ;;  %v2941_v43 = vld [vmem:[%s3653_s9] sm:$0xff]  }
 0x464   : > { %v3001_v45 = vpop.eup %3000 }
 0x465   : > { %v1123_v46 = vsel %vm1092_vm4, %v3001_v45, 0.0 }
 0x466   : > { %1124 = vadd.xlane.f32.xlu1 %v1123_v46  ;;  %v2943_v46 = vld [vmem:[%s3655_s11] sm:$0xff]  }
 0x468   : > { %v3003_v47 = vpop.eup %3002 }
 0x469   : > { %v1126_v48 = vsel %vm1092_vm4, %v3003_v47, 0.0 }
 0x46a   : > { %1127 = vadd.xlane.f32.xlu0 %v1126_v48 }
 0x477   : > { %889 = vrot.lane.b32.xlu1 %v3252_v52, %s3045_s25  ;;  %s3050_s25 = smov 32  }
 0x480   : > { %887 = vrot.lane.b32.xlu0 %v3252_v52, %s3047_s2 }
 0x487   : > { %v1119_v49 = vpop.xlane.xlu1 %1118 }
 0x488   : > { %3004 = vrcp.f32 %v1119_v49 }
 0x495   : > { %v3005_v50 = vpop.eup %3004 }
 0x496   : > { %v1133_v51 = vmul.f32 %v3005_v50, %v2997_v26 }
 0x498   : > { %v1137_v53 = vpack.c.bf16 %v1133_v51, %v1133_v51 }
 0x49a   : > { %2823 = vmatmul.mubr.msk.bf16.vlgmr.msra.gmra.mxu0 %vm1092_vm4, %v1137_v53 }
 0x49b   : > { %2834 = vmatprep.mubr.msk.bf16.mxu0 %vm3044_vm1, %v3043_v33 }
 0x4eb   : > { %v1122_v54 = vpop.xlane.xlu0 %1121 }
 0x4ec   : > { %3006 = vrcp.f32 %v1122_v54 }
 0x4ef   : > { %v1125_v55 = vpop.xlane.xlu1 %1124 }
 0x4f0   : > { %3008 = vrcp.f32 %v1125_v55 }
 0x4f3   : > { %v1128_v56 = vpop.xlane.xlu0 %1127  ;;  %v890_v60 = vpop.permute.xlu1 %889 }
 0x4f4   : > { %3010 = vrcp.f32 %v1128_v56  ;;  %v1284_v63 = vsel %vm1144_vm3, %v890_v60, 0 }
 0x4f7   : > { %v888_v57 = vpop.permute.xlu0 %887 }
 0x4f8   : > { %v1238_v58 = vsel %vm1144_vm3, %v888_v57, 0 }
 0x4f9   : > { %v3007_v52 = vpop.eup %3006  ;;  %2833 = vmatpush3.bf16.msra.mxu0 %v1238_v58 }
 0x4fa   : > { %v1134_v59 = vmul.f32 %v3007_v52, %v2999_v42  ;;  %2844 = vmatprep.subr.bf16.mxu0 %v3043_v33  ;;  %v2940_v42 = vld [vmem:[%s3654_s10 + $0x8] sm:$0xff]   ;;  %v2949_v52 = vld [vmem:[%s3657_s13] sm:$0xff]  }
 0x4fc   : > { %v1138_v61 = vpack.c.bf16 %v1134_v59, %v1134_v59 }
 0x4fd   : > { %v3009_v62 = vpop.eup %3008 }
 0x4fe   : > { %2829 = vmatmul.mubr.msk.bf16.vlgmr.msra.gmra.mxu1 %vm1092_vm4, %v1138_v61  ;;  %v1135_v0 = vmul.f32 %v3009_v62, %v3001_v45  ;;  %v2942_v45 = vld [vmem:[%s3654_s10] sm:$0xff]  }
 0x4ff   : > { %2839 = vmatpush3.bf16.msra.mxu1 %v1284_v63  ;;  %2840 = vmatprep.mubr.msk.bf16.mxu1 %vm3044_vm1, %v3043_v33 }
 0x500   : > { %v1139_v2 = vpack.c.bf16 %v1135_v0, %v1135_v0  ;;  %2856 = vmatprep.subr.bf16.mxu1 %v3043_v33  ;;  %v2952_v0 = vld [vmem:[%s3661_s17 + $0x64] ss:$16 sps:$4 sm:$0xff]  }
 0x501   : > { %v3011_v3 = vpop.eup %3010 }
 0x502   : > { %2835 = vmatmul.mubr.msk.bf16.vlgmr.msra.gmra.mxu0 %vm1092_vm4, %v1139_v2  ;;  %v1136_v4 = vmul.f32 %v3011_v3, %v3003_v47  ;;  %v2635_v47 = vld [vmem:[%s3652_s8] ss:$0 sm:$0xff]  ;;  %v2955_v2 = vld [vmem:[%s3661_s17 + $0x6c] ss:$16 sps:$4 sm:$0xff]  }
 0x503   : > { %2852 = vmatprep.mubr.msk.bf16.mxu0 %vm3044_vm1, %v3043_v33  ;;  %2845 = vmatpush3.bf16.msra.mxu0 %v2931_v6  ;;  %v2950_v3 = vld [vmem:[%s3661_s17 + $0x60] ss:$16 sps:$4 sm:$0xff]   ;;  %v2964_v6 = vld [vmem:[%s3661_s17 + $0x24] ss:$16 sps:$4 sm:$0xff]  }
 0x504   : > { %v1140_v5 = vpack.c.bf16 %v1136_v4, %v1136_v4  ;;  %2846 = vmatprep.subr.bf16.mxu0 %v3043_v33  ;;  %v2958_v4 = vld [vmem:[%s3661_s17 + $0x44] ss:$16 sps:$4 sm:$0xff]  }
 0x506   : > { %2841 = vmatmul.mubr.msk.bf16.vlgmr.msra.gmra.mxu1 %vm1092_vm4, %v1140_v5  ;;  %v2956_v5 = vld [vmem:[%s3661_s17 + $0x40] ss:$16 sps:$4 sm:$0xff]  }
 0x507   : > { %2864 = vmatprep.mubr.msk.bf16.mxu1 %vm3044_vm1, %v3043_v33  ;;  %2847 = vmatpush3.bf16.msra.mxu0 %v2932_v11 }
 0x508   : > { %2848 = vmatprep.subr.bf16.mxu0 %v3043_v33  ;;  %2857 = vmatpush3.bf16.msra.mxu1 %v2935_v15 }
 0x509   : > { %2858 = vmatprep.subr.bf16.mxu1 %v3043_v33 }
 0x50b   : > { %2849 = vmatpush3.bf16.msra.mxu0 %v2933_v13 }
 0x50c   : > { %2850 = vmatprep.subr.bf16.mxu0 %v3043_v33  ;;  %2859 = vmatpush3.bf16.msra.mxu1 %v2937_v17 }
 0x50d   : > { %2860 = vmatprep.subr.bf16.mxu1 %v3043_v33 }
 0x50f   : > { %2851 = vmatpush3.bf16.msra.mxu0 %v2934_v14 }
 0x510   : > { %2868 = vmatprep.subr.bf16.mxu0 %v3043_v33  ;;  %2861 = vmatpush3.bf16.msra.mxu1 %v2939_v41 }
 0x511   : > { %2862 = vmatprep.subr.bf16.mxu1 %v3043_v33 }
 0x514   : > { %2863 = vmatpush3.bf16.msra.mxu1 %v2941_v43 }
 0x515   : > { %2880 = vmatprep.subr.bf16.mxu1 %v2943_v46 }
 0x55a   : > { %v1182_v7 = vpop.f32.mrf.mxu0 }
 0x55c   : > { %v2824_v8 = vpop.f32.mrf.mxu0 }
 0x55d   : > { %v2968_v8 = vld [vmem:[%s3661_s17] ss:$16 sps:$4 sm:$0xff]  }
 0x55e   : > { %v1185_v9 = vpop.f32.mrf.mxu0 }
 0x55f   : > { %v2970_v9 = vld [vmem:[%s3661_s17 + $0x4] ss:$16 sps:$4 sm:$0xff]  }
 0x560   : > { %v2825_v10 = vpop.f32.mrf.mxu0 }
 0x561   : > { %v3052_v10 = vmov 1966171168  }
 0x562   : > { %v1701_v11 = vunpack.c.l.s4 %v3052_v10 }
 0x564   : > { %v1702_v15 = vunpack.c.0.s8 %v1701_v11 }
 0x5be   : > { %v1228_v16 = vpop.f32.mrf.mxu1 }
 0x5bf   : > { %1327 = vrot.lane.b32.xlu1 %v1228_v16, %s3049_s1  ;;  %s3681_s1 = sld [smem:[#allocation4_spill]] }
 0x5c0   : > { %v2830_v18 = vpop.f32.mrf.mxu1 }
 0x5c2   : > { %v1231_v19 = vpop.f32.mrf.mxu1  ;;  %v1274_v20 = vpop.f32.mrf.mxu0 }
 0x5c3   : > { %1331 = vrot.lane.b32.xlu0 %v1274_v20, %s3050_s25  ;;  %v1705_v20 = vsub.s32 %v1702_v15, %v3222_v28 }
 0x5c4   : > { %v2831_v21 = vpop.f32.mrf.mxu1  ;;  %v2836_v22 = vpop.f32.mrf.mxu0 }
 0x5c5   : > { %s717_s5 = scalar_lea.vmem %s3681_s1, %s2713_s4  ;;  %s3601_s1 = scalar_lea.vmem %s3666_s22, %s2713_s4 }
 0x5c6   : > { %v1277_v23 = vpop.f32.mrf.mxu0  ;;  %v1320_v24 = vpop.f32.mrf.mxu1  ;;  %v3367_v49 = vld [vmem:[%s717_s5] sm:$0xff]   ;;  %v3377_v57 = vld [vmem:[%s717_s5 + $0x8] sm:$0xff]   ;;  %v3387_v58 = vld [vmem:[%s717_s5 + $0x18] sm:$0xff]  }
 0x5c7   : > { %1335 = vrot.lane.b32.xlu1 %v1320_v24, %s3051_s26  ;;  %v2646_v24 = vld [vmem:[%s3656_s12] ss:$0 sm:$0xff] }
 0x5c8   : > { %v2837_v25 = vpop.f32.mrf.mxu0  ;;  %v2842_v26 = vpop.f32.mrf.mxu1 }
 0x5ca   : > { %v1323_v27 = vpop.f32.mrf.mxu1 }
 0x5cc   : > { %v2843_v30 = vpop.f32.mrf.mxu1 }
 0x631   : > { %v1328_v31 = vpop.permute.xlu1 %1327 }
 0x632   : > { %v1338_v34 = vsel %vm901_vm2, %v1182_v7, %v1328_v31  ;;  %v2962_v7 = vld [vmem:[%s3661_s17 + $0x20] ss:$16 sps:$4 sm:$0xff]  }
 0x635   : > { %v1332_v32 = vpop.permute.xlu0 %1331 }
 0x636   : > { %v1340_v35 = vsel %vm1339_vm5, %v1338_v34, %v1332_v32 }
 0x639   : > { %v1336_v36 = vpop.permute.xlu1 %1335 }
 0x63a   : > { %v1342_v37 = vsel %vm1341_vm6, %v1340_v35, %v1336_v36 }
 0x63b   : > { %v1343_v39 = vpack.c.bf16 %v1342_v37, %v1342_v37 }
 0x63d   : > { %2853 = vmatmul.mubr.msk.bf16.vlgmr.msra.gmra.mxu0 %vm739_vm0, %v1343_v39 }
 0x63e   : > { %2869 = vmatpush3.bf16.msra.mxu0 %v2936_v38  ;;  %2876 = vmatprep.mubr.msk.bf16.mxu0 %vm3044_vm1, %v3043_v33 }
 0x63f   : > { %2870 = vmatprep.subr.bf16.mxu0 %v3043_v33 }
 0x642   : > { %2871 = vmatpush3.bf16.msra.mxu0 %v2938_v40 }
 0x643   : > { %2872 = vmatprep.subr.bf16.mxu0 %v3043_v33 }
 0x646   : > { %2873 = vmatpush3.bf16.msra.mxu0 %v2940_v42 }
 0x647   : > { %2874 = vmatprep.subr.bf16.mxu0 %v3043_v33 }
 0x64a   : > { %2875 = vmatpush3.bf16.msra.mxu0 %v2942_v45 }
 0x64b   : > { %2890 = vmatprep.subr.bf16.mxu0 %v2949_v52 }
 0x6fd   : > { %v1413_v33 = vpop.f32.mrf.mxu0 }
 0x6fe   : > { %v1419_v48 = vadd.f32 %v1413_v33, %v3184_v1  ;;  %v3381_v1 = vld [vmem:[%s717_s5 + $0x10] sm:$0xff]  }
 0x6ff   : > { %v2854_v50 = vpop.f32.mrf.mxu0 }
 0x700   : > { %v3369_v51 = vadd.f32 %v2635_v47, %v1419_v48 }
 0x701   : > { %v1416_v53 = vpop.f32.mrf.mxu0 }
 0x702   : > { %v1428_v54 = vpack.c.bf16 %v3369_v51, %v3369_v51  ;;  %v2053_v55 = vsel %vm739_vm0, %v3369_v51, 0.0 }
 0x703   : > { %2054 = vadd.xlane.f32.xlu0 %v2053_v55  ;;  %v2855_v56 = vpop.f32.mrf.mxu0 }
 0x704   : > { %2865 = vmatmul.mubr.msk.bf16.vlgmr.msra.gmra.mxu1 %vm739_vm0, %v1428_v54  ;;  %2877 = vmatmul.mubr.msk.bf16.vlgmr.msra.gmra.mxu0 %vm739_vm0, %v1428_v54 }
 0x705   : > { %2881 = vmatpush3.bf16.msra.mxu1 %v2943_v46  ;;  %2882 = vmatprep.mubr.msk.bf16.mxu1 %vm901_vm2, %v3367_v49 }
 0x706   : > { %2891 = vmatpush3.bf16.msra.mxu0 %v2949_v52  ;;  %2212 = vmatprep.subr.bf16.mxu1 %v2952_v0 }
 0x707   : > { %2253 = vmatprep.subr.bf16.mxu0 %v2955_v2 }
 0x70c   : > { %2883 = vmatmul.mubr.msk.bf16.vlgmr.msra.gmra.mxu1 %vm901_vm2, %v3377_v57 }
 0x70d   : > { %2886 = vmatprep.mubr.msk.bf16.mxu1 %vm901_vm2, %v3381_v1  ;;  %2213 = vmatpush1.bf16.msra.mxu1 %v2950_v3 }
 0x70e   : > { %2214 = vmatprep.subr.bf16.mxu1 %v2958_v4 }
 0x711   : > { %2215 = vmatpush1.bf16.msra.mxu1 %v2956_v5 }
 0x712   : > { %2216 = vmatprep.subr.bf16.mxu1 %v2964_v6 }
 0x714   : > { %2887 = vmatmul.mubr.msk.bf16.gmra.mxu1 %vm901_vm2, %v3387_v58 }
 0x715   : > { %2236 = vmatprep.mubr.bf16.mxu1 %v3042_v12  ;;  %2217 = vmatpush1.bf16.msra.mxu1 %v2962_v7 }
 0x716   : > { %2218 = vmatprep.subr.bf16.mxu1 %v2970_v9 }
 0x719   : > { %2219 = vmatpush1.bf16.msra.mxu1 %v2968_v8 }
 0x78c   : > { %v2055_v59 = vpop.xlane.xlu0 %2054 }
 0x78d   : > { %v2056_v60 = vmul.f32 0.015625, %v2055_v59 }
 0x78f   : > { %v3396_v61 = vsub.f32 %v3369_v51, %v2056_v60 }
 0x791   : > { %v2058_v62 = vmul.f32 %v3396_v61, %v3396_v61 }
 0x793   : > { %v2059_v63 = vsel %vm739_vm0, %v2058_v62, 0.0 }
 0x794   : > { %2060 = vadd.xlane.f32.xlu1 %v2059_v63 }
 0x7c4   : > { %v1498_v13 = vpop.f32.mrf.mxu1  ;;  %v3428_v14 = vpop.f32.mrf.mxu0 }
 0x7c5   : > { %1504 = vst.msk [vmem:[#allocation2] sm:$0xff] %vm901_vm2, %v1498_v13 }
 0x7c6   : > { %v2866_v16 = vpop.f32.mrf.mxu1  ;;  %v2878_v17 = vpop.f32.mrf.mxu0 }
 0x7c8   : > { %v1501_v18 = vpop.f32.mrf.mxu1  ;;  %v1574_v19 = vpop.f32.mrf.mxu0 }
 0x7ca   : > { %v2867_v21 = vpop.f32.mrf.mxu1  ;;  %v2879_v22 = vpop.f32.mrf.mxu0 }
 0x7cc   : > { %v2884_v23 = vpop.f32.mrf.mxu1  ;;  %v1697_v25 = vld [vmem:[#allocation2] sm:$0xff] }
 0x7cd   : > { %v1706_v26 = vrot.slane %v1697_v25, %v1705_v20  ;;  %v1699_v27 = vcombine.high %v1697_v25, %v1697_v25  ;;  %v1675_v37 = vadd.f32 %v2884_v23, %v2646_v24 }
 0x7ce   : > { %v1666_v30 = vpop.f32.mrf.mxu1 }
 0x7cf   : > { %v1722_v31 = vrot.slane %v1706_v26, %v1705_v20  ;;  %v1667_v32 = vadd.f32 %v2646_v24, %v1666_v30  ;;  %v1714_v34 = vcombine.high %v1706_v26, %v1706_v26  ;;  %v1713_v35 = vrot.slane %v1699_v27, %v1705_v20 }
 0x7d0   : > { %v2885_v36 = vpop.f32.mrf.mxu1 }
 0x7d1   : > { %v1744_v38 = vcombine.high %v1722_v31, %v1722_v31  ;;  %v1751_v39 = vrot.slane %v1722_v31, %v3225_v29  ;;  %v1736_v40 = vrot.slane %v1714_v34, %v1705_v20  ;;  %v1678_v41 = vadd.f32 %v2885_v36, %v2646_v24 }
 0x7d2   : > { %v1669_v42 = vpop.f32.mrf.mxu1  ;;  %v1729_v43 = vrot.slane %v1713_v35, %v1705_v20  ;;  %v1715_v45 = vcombine.high %v1713_v35, %v1713_v35 }
 0x7d3   : > { %v1759_v46 = vrot.slane %v1744_v38, %v3225_v29  ;;  %v1788_v33 = vadd.f32 %v1751_v39, %v1667_v32  ;;  %v1746_v47 = vcombine.high %v1736_v40, %v1736_v40  ;;  %v1670_v48 = vadd.f32 %v2646_v24, %v1669_v42 }
 0x7d4   : > { %v1755_v50 = vrot.slane %v1736_v40, %v3225_v29  ;;  %v2888_v53 = vpop.f32.mrf.mxu1  ;;  %v1745_v54 = vcombine.high %v1729_v43, %v1729_v43  ;;  %v1743_v55 = vrot.slane %v1715_v45, %v1705_v20  ;;  %v1767_v2 = vrot.slane %v1729_v43, %v3225_v29 }
 0x7d5   : > { %v1790_v56 = vadd.f32 %v1759_v46, %v1675_v37  ;;  %v1796_v52 = vadd.f32 %v1788_v33, %v3428_v14  ;;  %v1763_v59 = vrot.slane %v1746_v47, %v3225_v29  ;;  %v1691_v60 = vadd.f32 %v2888_v53, %v2646_v24 }
 0x7d6   : > { %v1789_v62 = vadd.f32 %v1755_v50, %v1670_v48  ;;  %v1775_v63 = vrot.slane %v1745_v54, %v3225_v29  ;;  %v1682_v0 = vpop.f32.mrf.mxu1  ;;  %v1747_v3 = vcombine.high %v1743_v55, %v1743_v55  ;;  %v1771_v11 = vrot.slane %v1743_v55, %v3225_v29 }
 0x7d7   : > { %v1798_v4 = vadd.f32 %v1790_v56, %v3428_v14  ;;  %v3443_v5 = vpack.c.bf16 %v1796_v52, %v1796_v52  ;;  %v1791_v6 = vadd.f32 %v1763_v59, %v1678_v41  ;;  %v1683_v7 = vadd.f32 %v2646_v24, %v1682_v0 }
 0x7d8   : > { %v1797_v8 = vadd.f32 %v1789_v62, %v3428_v14  ;;  %v1794_v9 = vadd.f32 %v1775_v63, %v1691_v60  ;;  %v2889_v10 = vpop.f32.mrf.mxu1  ;;  %v1779_v21 = vrot.slane %v1747_v3, %v3225_v29 }
 0x7d9   : > { %v3447_v13 = vpack.c.bf16 %v1798_v4, %v1798_v4  ;;  %v1812_v15 = vmul.bf16 %v3443_v5, %v3443_v5  ;;  %v1799_v16 = vadd.f32 %v1791_v6, %v3428_v14  ;;  %v1792_v17 = vadd.f32 %v1767_v2, %v1683_v7 }
 0x7da   : > { %v3452_v18 = vpack.c.bf16 %v1797_v8, %v1797_v8  ;;  %v1802_v19 = vadd.f32 %v1794_v9, %v3428_v14  ;;  %v1694_v20 = vadd.f32 %v2889_v10, %v2646_v24  ;;  %v1685_v22 = vpop.f32.mrf.mxu1 }
 0x7db   : > { %v1814_v23 = vmul.bf16 %v3447_v13, %v3447_v13  ;;  %v1820_v25 = vmul.bf16 %v1812_v15, %v3443_v5  ;;  %v3459_v26 = vpack.c.bf16 %v1799_v16, %v1799_v16  ;;  %v1800_v27 = vadd.f32 %v1792_v17, %v3428_v14 }
 0x7dc   : > { %v1813_v30 = vmul.bf16 %v3452_v18, %v3452_v18  ;;  %v3464_v31 = vpack.c.bf16 %v1802_v19, %v1802_v19  ;;  %v1795_v32 = vadd.f32 %v1779_v21, %v1694_v20  ;;  %v1686_v34 = vadd.f32 %v2646_v24, %v1685_v22 }
 0x7dd   : > { %v1822_v35 = vmul.bf16 %v1814_v23, %v3447_v13  ;;  %v1828_v36 = vmul.bf16 1027030327, %v1820_v25  ;;  %v1815_v37 = vmul.bf16 %v3459_v26, %v3459_v26  ;;  %v3469_v38 = vpack.c.bf16 %v1800_v27, %v1800_v27 }
 0x7de   : > { %v1821_v39 = vmul.bf16 %v1813_v30, %v3452_v18  ;;  %v1818_v40 = vmul.bf16 %v3464_v31, %v3464_v31  ;;  %v1803_v41 = vadd.f32 %v1795_v32, %v3428_v14  ;;  %v1793_v42 = vadd.f32 %v1771_v11, %v1686_v34 }
 0x7df   : > { %v1830_v43 = vmul.bf16 1027030327, %v1822_v35  ;;  %v1836_v45 = vadd.bf16 %v1828_v36, %v3443_v5  ;;  %v1823_v24 = vmul.bf16 %v1815_v37, %v3459_v26  ;;  %v1816_v46 = vmul.bf16 %v3469_v38, %v3469_v38 }
 0x7e0   : > { %v1829_v33 = vmul.bf16 1027030327, %v1821_v39  ;;  %v1826_v47 = vmul.bf16 %v1818_v40, %v3464_v31  ;;  %v3480_v48 = vpack.c.bf16 %v1803_v41, %v1803_v41  ;;  %v1801_v50 = vadd.f32 %v1793_v42, %v3428_v14 }
 0x7e1   : > { %v1838_v53 = vadd.bf16 %v1830_v43, %v3447_v13  ;;  %v1844_v54 = vmul.bf16 1061961548, %v1836_v45  ;;  %v1831_v55 = vmul.bf16 1027030327, %v1823_v24  ;;  %v1824_v56 = vmul.bf16 %v1816_v46, %v3469_v38 }
 0x7e2   : > { %v1837_v52 = vadd.bf16 %v1829_v33, %v3452_v18  ;;  %v1834_v59 = vmul.bf16 1027030327, %v1826_v47  ;;  %v1819_v60 = vmul.bf16 %v3480_v48, %v3480_v48  ;;  %v3488_v62 = vpack.c.bf16 %v1801_v50, %v1801_v50 }
 0x7e3   : > { %v1846_v63 = vmul.bf16 1061961548, %v1838_v53  ;;  %3012 = vtanh.bf16 %v1844_v54  ;;  %v1839_v0 = vadd.bf16 %v1831_v55, %v3459_v26  ;;  %v1832_v2 = vmul.bf16 1027030327, %v1824_v56  ;;  %v2953_v55 = vld [vmem:[%s3661_s17 + $0x68] ss:$16 sps:$4 sm:$0xff]  }
 0x7e4   : > { %v1845_v14 = vmul.bf16 1061961548, %v1837_v52  ;;  %v1842_v3 = vadd.bf16 %v1834_v59, %v3464_v31  ;;  %v1827_v4 = vmul.bf16 %v1819_v60, %v3480_v48  ;;  %v1817_v6 = vmul.bf16 %v3488_v62, %v3488_v62 }
 0x7e5   : > { %3014 = vtanh.bf16 %v1846_v63  ;;  %v1847_v7 = vmul.bf16 1061961548, %v1839_v0  ;;  %v1840_v8 = vadd.bf16 %v1832_v2, %v3469_v38  ;;  %v2959_v63 = vld [vmem:[%s3661_s17 + $0x48] ss:$16 sps:$4 sm:$0xff]   ;;  %v2967_v2 = vld [vmem:[%s3661_s17 + $0x2c] ss:$16 sps:$4 sm:$0xff]  }
 0x7e6   : > { %3016 = vtanh.bf16 %v1845_v14  ;;  %v1850_v9 = vmul.bf16 1061961548, %v1842_v3  ;;  %v1835_v10 = vmul.bf16 1027030327, %v1827_v4  ;;  %v1825_v11 = vmul.bf16 %v1817_v6, %v3488_v62 }
 0x7e7   : > { %3018 = vtanh.bf16 %v1847_v7  ;;  %v1848_v15 = vmul.bf16 1061961548, %v1840_v8  ;;  %v2965_v7 = vld [vmem:[%s3661_s17 + $0x28] ss:$16 sps:$4 sm:$0xff]  }
 0x7e8   : > { %3020 = vtanh.bf16 %v1850_v9  ;;  %v1843_v16 = vadd.bf16 %v1835_v10, %v3480_v48  ;;  %v1833_v17 = vmul.bf16 1027030327, %v1825_v11  ;;  %v2674_v11 = vld [vmem:[%s3659_s15] ss:$0 sm:$0xff] }
 0x7e9   : > { %3022 = vtanh.bf16 %v1848_v15 }
 0x7ea   : > { %v1851_v19 = vmul.bf16 1061961548, %v1843_v16  ;;  %v1841_v20 = vadd.bf16 %v1833_v17, %v3488_v62  ;;  %v2675_v16 = vld [vmem:[%s3660_s16] ss:$0 sm:$0xff] }
 0x7ec   : > { %3024 = vtanh.bf16 %v1851_v19  ;;  %v1849_v21 = vmul.bf16 1061961548, %v1841_v20  ;;  %v2974_v20 = vld [vmem:[%s3663_s19 + $0x78] sm:$0xff]  }
 0x7ed   : > { %2774 = vmatprep.subr.bf16.mxu1 %v2974_v20 }
 0x7ee   : > { %3026 = vtanh.bf16 %v1849_v21  ;;  %v2975_v21 = vld [vmem:[%s3663_s19 + $0x38] sm:$0xff]  }
 0x7f1   : > { %v3013_v22 = vpop.eup %3012 }
 0x7f2   : > { %v1860_v23 = vadd.bf16 1065369472, %v3013_v22  ;;  %v2977_v22 = vld [vmem:[%s3663_s19 + $0x30] sm:$0xff]  }
 0x7f3   : > { %v3015_v25 = vpop.eup %3014 }
 0x7f4   : > { %v3017_v27 = vpop.eup %3016  ;;  %v1862_v30 = vadd.bf16 1065369472, %v3015_v25  ;;  %v1868_v35 = vmul.bf16 1056980736, %v1860_v23  ;;  %v2978_v23 = vld [vmem:[%s3663_s19 + $0x68] sm:$0xff]  }
 0x7f5   : > { %v3019_v32 = vpop.eup %3018  ;;  %v1861_v34 = vadd.bf16 1065369472, %v3017_v27  ;;  %v2979_v25 = vld [vmem:[%s3663_s19 + $0x28] sm:$0xff]   ;;  %v2980_v27 = vld [vmem:[%s3663_s19 + $0x60] sm:$0xff]  }
 0x7f6   : > { %v3021_v36 = vpop.eup %3020  ;;  %v1870_v37 = vmul.bf16 1056980736, %v1862_v30  ;;  %v1863_v39 = vadd.bf16 1065369472, %v3019_v32  ;;  %v1876_v43 = vmul.bf16 %v1868_v35, %v3443_v5  ;;  %v2961_v5 = vld [vmem:[%s3661_s17 + $0x4c] ss:$16 sps:$4 sm:$0xff]  }
 0x7f7   : > { %v3023_v40 = vpop.eup %3022  ;;  %v1869_v41 = vmul.bf16 1056980736, %v1861_v34  ;;  %v1866_v50 = vadd.bf16 1065369472, %v3021_v36  ;;  %v2981_v30 = vld [vmem:[%s3663_s19 + $0x20] sm:$0xff]   ;;  %v2982_v32 = vld [vmem:[%s3663_s19 + $0x58] sm:$0xff]  }
 0x7f8   : > { %v1871_v42 = vmul.bf16 1056980736, %v1863_v39  ;;  %v1864_v24 = vadd.bf16 1065369472, %v3023_v40  ;;  %v1878_v33 = vmul.bf16 %v1870_v37, %v3447_v13  ;;  %v2983_v34 = vld [vmem:[%s3663_s19 + $0x18] sm:$0xff]   ;;  %v2984_v35 = vld [vmem:[%s3663_s19 + $0x50] sm:$0xff]  }
 0x7f9   : > { %v1877_v45 = vmul.bf16 %v1869_v41, %v3452_v18  ;;  %v2985_v36 = vld [vmem:[%s3663_s19 + $0x10] sm:$0xff]   ;;  %v2986_v37 = vld [vmem:[%s3663_s19 + $0x48] sm:$0xff]   ;;  %v2988_v40 = vld [vmem:[%s3663_s19 + $0x40] sm:$0xff]  }
 0x7fa   : > { %v3025_v46 = vpop.eup %3024  ;;  %v1879_v47 = vmul.bf16 %v1871_v42, %v3459_v26  ;;  %v1872_v59 = vmul.bf16 1056980736, %v1864_v24  ;;  %v1874_v26 = vmul.bf16 1056980736, %v1866_v50  ;;  %v2987_v39 = vld [vmem:[%s3663_s19 + $0x8] sm:$0xff]   ;;  %v2989_v41 = vld [vmem:[%s3663_s19] sm:$0xff]  }
 0x7fb   : > { %v2657_v53 = vcombine.low %v1876_v43, %v1877_v45  ;;  %v1867_v54 = vadd.bf16 1065369472, %v3025_v46  ;;  %v2656_v42 = vld [vmem:[%s3658_s14] ss:$0 sm:$0xff]  ;;  %v1998_v43 = vunpack.c.l.bf16 %v3377_v57  ;;  %v1996_v46 = vunpack.c.l.bf16 %v3367_v49 }
 0x7fc   : > { %v3027_v56 = vpop.eup %3026  ;;  %v2658_v52 = vcombine.low %v1878_v33, %v1879_v47  ;;  %v1880_v14 = vmul.bf16 %v1872_v59, %v3469_v38  ;;  %v1882_v4 = vmul.bf16 %v1874_v26, %v3464_v31  ;;  %v2971_v31 = vld [vmem:[%s3661_s17 + $0x8] ss:$16 sps:$4 sm:$0xff]   ;;  %v2002_v26 = vunpack.c.l.bf16 %v3387_v58 }
 0x7fd   : > { %2892 = vmatprep.mubr.msk.bf16.mxu0 %vm901_vm2, %v2657_v53  ;;  %v1865_v18 = vadd.bf16 1065369472, %v3027_v56  ;;  %v1875_v13 = vmul.bf16 1056980736, %v1867_v54  ;;  %v1999_v53 = vunpack.c.h.bf16 %v3377_v57 }
 0x7fe   : > { %2893 = vmatmul.mubr.msk.bf16.vlgmr.msra.gmra.mxu0 %vm901_vm2, %v2658_v52 }
 0x7ff   : > { %v1873_v60 = vmul.bf16 1056980736, %v1865_v18  ;;  %2254 = vmatpush1.bf16.msra.mxu0 %v2953_v55  ;;  %v1883_v0 = vmul.bf16 %v1875_v13, %v3480_v48  ;;  %v2973_v48 = vld [vmem:[%s3661_s17 + $0xc] ss:$16 sps:$4 sm:$0xff]  }
 0x800   : > { %2255 = vmatprep.subr.bf16.mxu0 %v2961_v5  ;;  %v1997_v5 = vunpack.c.h.bf16 %v3367_v49 }
 0x801   : > { %v1881_v3 = vmul.bf16 %v1873_v60, %v3488_v62  ;;  %v2660_v8 = vcombine.low %v1882_v4, %v1883_v0 }
 0x803   : > { %v2659_v6 = vcombine.low %v1880_v14, %v1881_v3  ;;  %2256 = vmatpush1.bf16.msra.mxu0 %v2959_v63  ;;  %v2000_v14 = vunpack.c.l.bf16 %v3381_v1 }
 0x804   : > { %2257 = vmatprep.subr.bf16.mxu0 %v2967_v2 }
 0x805   : > { %2896 = vmatprep.mubr.msk.bf16.mxu0 %vm901_vm2, %v2659_v6 }
 0x806   : > { %2897 = vmatmul.mubr.msk.bf16.gmra.mxu0 %vm901_vm2, %v2660_v8 }
 0x807   : > { %2258 = vmatpush1.bf16.msra.mxu0 %v2965_v7  ;;  %2277 = vmatprep.mubr.bf16.mxu0 %v3042_v12  ;;  %v2003_v7 = vunpack.c.h.bf16 %v3387_v58 }
 0x808   : > { %2259 = vmatprep.subr.bf16.mxu0 %v2973_v48 }
 0x80b   : > { %2260 = vmatpush1.bf16.msra.mxu0 %v2971_v31 }
 0x81d   : > { %v2061_v38 = vpop.xlane.xlu1 %2060 }
 0x81e   : > { %v2062_v62 = vmul.f32 0.015625, %v2061_v38 }
 0x820   : > { %v2063_v9 = vadd.f32 1e-05, %v2062_v62  ;;  %v2001_v62 = vunpack.c.h.bf16 %v3381_v1 }
 0x822   : > { %3028 = vrsqrt.f32 %v2063_v9 }
 0x82f   : > { %v3029_v10 = vpop.eup %3028 }
 0x830   : > { %v2065_v15 = vmul.f32 %v3029_v10, %v3396_v61  ;;  %v2976_v61 = vld [vmem:[%s3663_s19 + $0x70] sm:$0xff]  }
 0x832   : > { %v2073_v17 = vmul.f32 %v2674_v11, %v2065_v15 }
 0x834   : > { %v2081_v19 = vadd.f32 %v2675_v16, %v2073_v17 }
 0x836   : > { %v2082_v12 = vpack.c.bf16 %v2081_v19, %v2081_v19  ;;  %v2099_v19 = vld [vmem:[%s3662_s18] sm:$0xf] }
 0x837   : > { %v2104_v1 = vrot.slane %v2099_v19, %v3225_v29 }
 0x838   : > { %2692 = vmatmul.mubr.msk.bf16.vlgmr.msra.gmra.mxu1 %vm739_vm0, %v2082_v12  ;;  %2693 = vmatmul.mubr.msk.bf16.vlgmr.msra.gmra.mxu0 %vm739_vm0, %v2082_v12  ;;  %v2108_v12 = vrot.slane %v2099_v19, %v787_v44 }
 0x839   : > { %2775 = vmatpush3.bf16.msra.mxu1 %v2975_v21 }
 0x83a   : > { %2776 = vmatprep.subr.bf16.mxu1 %v2976_v61 }
 0x83d   : > { %2777 = vmatpush3.bf16.msra.mxu1 %v2977_v22 }
 0x83e   : > { %2778 = vmatprep.subr.bf16.mxu1 %v2978_v23 }
 0x841   : > { %2779 = vmatpush3.bf16.msra.mxu1 %v2979_v25 }
 0x842   : > { %2780 = vmatprep.subr.bf16.mxu1 %v2980_v27 }
 0x845   : > { %2781 = vmatpush3.bf16.msra.mxu1 %v2981_v30 }
 0x846   : > { %2782 = vmatprep.subr.bf16.mxu1 %v2982_v32 }
 0x849   : > { %2783 = vmatpush3.bf16.msra.mxu1 %v2983_v34 }
 0x84a   : > { %2784 = vmatprep.subr.bf16.mxu1 %v2984_v35 }
 0x84d   : > { %2785 = vmatpush3.bf16.msra.mxu1 %v2985_v36 }
 0x84e   : > { %2786 = vmatprep.subr.bf16.mxu1 %v2986_v37 }
 0x851   : > { %2787 = vmatpush3.bf16.msra.mxu1 %v2987_v39 }
 0x852   : > { %2788 = vmatprep.subr.bf16.mxu1 %v2988_v40 }
 0x855   : > { %2789 = vmatpush3.bf16.msra.mxu1 %v2989_v41 }
 0x8be   : > { %v2894_v45 = vpop.f32.mrf.mxu0 }
 0x8bf   : > { %v1974_v24 = vadd.f32 %v2894_v45, %v2656_v42  ;;  %v2111_v45 = vsub.s32 2, %v3222_v28 }
 0x8c0   : > { %v1965_v33 = vpop.f32.mrf.mxu0 }
 0x8c1   : > { %v2006_v47 = vadd.f32 %v1998_v43, %v1974_v24  ;;  %v1966_v50 = vadd.f32 %v2656_v42, %v1965_v33  ;;  %v2115_v24 = vsub.s32 3, %v3222_v28 }
 0x8c2   : > { %v2895_v54 = vpop.f32.mrf.mxu0 }
 0x8c3   : > { %v2718_v55 = vpack.c.bf16 %v2006_v47, %v2006_v47  ;;  %v2004_v56 = vadd.f32 %v1996_v46, %v1966_v50  ;;  %v1977_v52 = vadd.f32 %v2895_v54, %v2656_v42  ;;  %v2112_v50 = vrot.slane %v2099_v19, %v2111_v45 }
 0x8c4   : > { %v1968_v18 = vpop.f32.mrf.mxu0  ;;  %v2116_v54 = vrot.slane %v2099_v19, %v2115_v24 }
 0x8c5   : > { %2047 = vst.msk [vmem:[%s3601_s1 + $0x8] sm:$0xf] %vm2044_vm7, %v2718_v55  ;;  %v2716_v57 = vpack.c.bf16 %v2004_v56, %v2004_v56  ;;  %v2007_v59 = vadd.f32 %v1999_v53, %v1977_v52  ;;  %v1969_v13 = vadd.f32 %v2656_v42, %v1968_v18 }
 0x8c6   : > { %v2898_v60 = vpop.f32.mrf.mxu0 }
 0x8c7   : > { %2045 = vst.msk [vmem:[%s3601_s1] sm:$0xf] %vm2044_vm7, %v2716_v57  ;;  %v2719_v63 = vpack.c.bf16 %v2007_v59, %v2007_v59  ;;  %v2005_v0 = vadd.f32 %v1997_v5, %v1969_v13  ;;  %v1990_v2 = vadd.f32 %v2898_v60, %v2656_v42 }
 0x8c8   : > { %v1981_v3 = vpop.f32.mrf.mxu0 }
 0x8c9   : > { %2048 = vst.msk [vmem:[%s3601_s1 + $0xc] sm:$0xf] %vm2044_vm7, %v2719_v63  ;;  %v2717_v49 = vpack.c.bf16 %v2005_v0, %v2005_v0  ;;  %v2010_v4 = vadd.f32 %v2002_v26, %v1990_v2  ;;  %v1982_v6 = vadd.f32 %v2656_v42, %v1981_v3  ;;  %v2710_v2 = vld [vmem:[%s3664_s20] ss:$0 sm:$0xff] }
 0x8ca   : > { %v2899_v8 = vpop.f32.mrf.mxu0 }
 0x8cb   : > { %2046 = vst.msk [vmem:[%s3601_s1 + $0x4] sm:$0xf] %vm2044_vm7, %v2717_v49  ;;  %v2722_v48 = vpack.c.bf16 %v2010_v4, %v2010_v4  ;;  %v2008_v31 = vadd.f32 %v2000_v14, %v1982_v6  ;;  %v1993_v38 = vadd.f32 %v2899_v8, %v2656_v42 }
 0x8cc   : > { %v1984_v9 = vpop.f32.mrf.mxu0 }
 0x8cd   : > { %2051 = vst.msk [vmem:[%s3601_s1 + $0x18] sm:$0xf] %vm2044_vm7, %v2722_v48  ;;  %v2720_v10 = vpack.c.bf16 %v2008_v31, %v2008_v31  ;;  %v2011_v11 = vadd.f32 %v2003_v7, %v1993_v38  ;;  %v1985_v15 = vadd.f32 %v2656_v42, %v1984_v9 }
 0x8cf   : > { %2049 = vst.msk [vmem:[%s3601_s1 + $0x10] sm:$0xf] %vm2044_vm7, %v2720_v10  ;;  %v2723_v16 = vpack.c.bf16 %v2011_v11, %v2011_v11  ;;  %v2009_v17 = vadd.f32 %v2001_v62, %v1985_v15 }
 0x8d1   : > { %2052 = vst.msk [vmem:[%s3601_s1 + $0x1c] sm:$0xf] %vm2044_vm7, %v2723_v16  ;;  %v2721_v58 = vpack.c.bf16 %v2009_v17, %v2009_v17 }
 0x8d3   : > { %2050 = vst.msk [vmem:[%s3601_s1 + $0x14] sm:$0xf] %vm2044_vm7, %v2721_v58 }
 0x8f8   : > { %v2238_v20 = vpop.f32.mrf.mxu1  ;;  %v2279_v21 = vpop.f32.mrf.mxu0 }
 0x8f9   : > { %v2239_v61 = vadd.f32 %v2238_v20, %v2104_v1  ;;  %v2280_v5 = vadd.f32 %v2279_v21, %v2112_v50 }
 0x8fa   : > { %v2240_v22 = vpop.f32.mrf.mxu1  ;;  %v2281_v23 = vpop.f32.mrf.mxu0 }
 0x8fb   : > { %v2286_v25 = vmul.f32 %v2239_v61, %v2239_v61  ;;  %v2241_v27 = vadd.f32 %v2240_v22, %v2108_v12  ;;  %v2282_v18 = vadd.f32 %v2281_v23, %v2116_v54 }
 0x8fc   : > { %v2242_v30 = vpop.f32.mrf.mxu1  ;;  %v2283_v32 = vpop.f32.mrf.mxu0 }
 0x8fd   : > { %v2288_v34 = vmul.f32 %v2286_v25, %v2239_v61  ;;  %v2287_v35 = vmul.f32 %v2241_v27, %v2241_v27 }
 0x8fe   : > { %v2243_v36 = vpop.f32.mrf.mxu1  ;;  %v2284_v37 = vpop.f32.mrf.mxu0 }
 0x8ff   : > { %v2290_v39 = vmul.f32 0.044715, %v2288_v34  ;;  %v2289_v40 = vmul.f32 %v2287_v35, %v2241_v27 }
 0x901   : > { %v2292_v41 = vadd.f32 %v2290_v39, %v2239_v61  ;;  %v2291_v29 = vmul.f32 0.044715, %v2289_v40 }
 0x903   : > { %v2294_v42 = vmul.f32 0.7978846, %v2292_v41  ;;  %v2293_v43 = vadd.f32 %v2291_v29, %v2241_v27 }
 0x905   : > { %3030 = vtanh.f32 %v2294_v42  ;;  %v2295_v44 = vmul.f32 0.7978846, %v2293_v43 }
 0x907   : > { %3032 = vtanh.f32 %v2295_v44 }
 0x912   : > { %v3031_v46 = vpop.eup %3030 }
 0x913   : > { %v2298_v33 = vadd.f32 1.0, %v3031_v46 }
 0x914   : > { %v3033_v47 = vpop.eup %3032 }
 0x915   : > { %v2300_v53 = vmul.f32 0.5, %v2298_v33  ;;  %v2299_v55 = vadd.f32 1.0, %v3033_v47 }
 0x917   : > { %v2302_v56 = vmul.f32 %v2300_v53, %v2239_v61  ;;  %v2301_v52 = vmul.f32 0.5, %v2299_v55 }
 0x919   : > { %v2303_v57 = vmul.f32 %v2301_v52, %v2241_v27  ;;  %v2304_v59 = vmul.f32 %v2302_v56, %v2280_v5 }
 0x91b   : > { %v2305_v13 = vmul.f32 %v2303_v57, %v2282_v18  ;;  %v2306_v60 = vpack.c.bf16 %v2304_v59, %v2304_v59 }
 0x91d   : > { %v2307_v26 = vpack.c.bf16 %v2305_v13, %v2305_v13 }
 0x91f   : > { %2468 = vmatprep.mubr.bf16.mxu1 %v2307_v26 }
 0x920   : > { %2469 = vmatmul.mubr.bf16.vlgmr.msra.gmra.mxu1 %v2306_v60 }
 0x9e0   : > { %v2790_v28 = vpop.f32.mrf.mxu1 }
 0x9e2   : > { %v2791_v63 = vpop.f32.mrf.mxu1 }
 0x9e3   : > { %v2792_v0 = vadd.f32 %v2791_v63, %v2790_v28 }
 0x9e4   : > { %v2793_v14 = vpop.f32.mrf.mxu1 }
 0x9e5   : > { %v2476_v3 = vadd.f32 %v2792_v0, %v3369_v51 }
 0x9e6   : > { %v2794_v49 = vpop.f32.mrf.mxu1 }
 0x9e7   : > { %v2484_v4 = vadd.f32 %v2710_v2, %v2476_v3 }
 0x9e9   : > { %v2485_v6 = vpack.c.bf16 %v2484_v4, %v2484_v4 }
 0x9eb   : > { %2487 = vst.msk [vmem:[%s726_s27] sm:$0xf] %vm2486_vm8, %v2485_v6 }
 0x9ec PF: > { %s33_s3 = sadd.s32 1, %s3040_s3  }
 0x9ed   : > { %p30_p4 = scmp.ge.s32.totalorder %s33_s3, 4  }
 0x9ef   :  { %32 = sbr.rel (!%p30_p4) target bundleno = 8 (0x8), region = 152 }

</bundles_post_ra>
